<compile_context>
chip_gen: v6e
topology: v6e:2x2x1
jax: 0.10.0
libtpu: 0.0.40
codegen_flags: <defaults>
</compile_context>

<pallas_src>
import functools
import math

import jax
import jax.numpy as jnp
from jax import lax
from jax.experimental import pallas as pl
from jax.experimental.pallas import tpu as pltpu

P_DROP = 0.25
KEEP = 1.0 - P_DROP
# keep iff (hash & 0xFFFFFF) >= this  ->  P(keep) = 0.75 exactly
_KEEP_THRESH_24 = int(P_DROP * (1 << 24))


def _as_i32(v):
    """Python int -> value representable as signed int32 (two's complement)."""
    v &= 0xFFFFFFFF
    return v - (1 << 32) if v >= (1 << 31) else v


_K_GOLD = _as_i32(0x9E3779B1)
_K_M1 = _as_i32(0x85EBCA6B)
_K_M2 = _as_i32(0xC2B2AE35)


def _srl(h, k):
    """Logical right shift of int32 by constant k (arith shift + mask)."""
    return (h >> k) & jnp.int32((1 << (32 - k)) - 1)


def _fmix32(h):
    """murmur3 finalizer on int32 with wrapping arithmetic."""
    h = h ^ _srl(h, 16)
    h = h * jnp.int32(_K_M1)
    h = h ^ _srl(h, 13)
    h = h * jnp.int32(_K_M2)
    h = h ^ _srl(h, 16)
    return h


def _keep_mask(shape, row_offset, seed, salt):
    """Boolean keep mask (P(keep)=0.75), deterministic in (seed, salt, elem idx)."""
    rows = lax.broadcasted_iota(jnp.int32, shape, 0) + row_offset
    cols = lax.broadcasted_iota(jnp.int32, shape, 1)
    base = _as_i32(seed * 0x9E3779B1 + (salt + 1) * 0xC2B2AE35)
    h = (rows * jnp.int32(_K_GOLD) + jnp.int32(base)) ^ (cols * jnp.int32(_K_M1))
    h = _fmix32(h)
    u24 = h & jnp.int32(0x00FFFFFF)
    return u24 >= jnp.int32(_KEEP_THRESH_24)


def lenet300_kernel(tile_b, seed,
                    x_ref, w1_ref, b1_ref, w2_ref, b2_ref, w3_ref, b3_ref,
                    out_ref):
    row_off = pl.program_id(0) * tile_b

    # --- dropout(p=0.25) on flattened input (1/keep scale folded into w1) ---
    x = x_ref[...]                                                # (tile_b, 784) f32
    h0 = jnp.where(_keep_mask(x.shape, row_off, seed, 0), x, jnp.float32(0.0))

    # --- fc1 + relu + dropout ---
    a1 = jnp.dot(h0.astype(jnp.bfloat16), w1_ref[...],
                 preferred_element_type=jnp.float32) + b1_ref[...]  # (tile_b, 384)
    r1 = jnp.maximum(a1, 0.0)
    h1 = jnp.where(_keep_mask(r1.shape, row_off, seed, 1), r1, jnp.float32(0.0))

    # --- fc2 + relu + dropout ---
    a2 = jnp.dot(h1.astype(jnp.bfloat16), w2_ref[...],
                 preferred_element_type=jnp.float32) + b2_ref[...]  # (tile_b, 128)
    r2 = jnp.maximum(a2, 0.0)
    h2 = jnp.where(_keep_mask(r2.shape, row_off, seed, 2), r2, jnp.float32(0.0))

    # --- fc3 ---
    a3 = jnp.dot(h2.astype(jnp.bfloat16), w3_ref[...],
                 preferred_element_type=jnp.float32) + b3_ref[...]  # (tile_b, 128)
    out_ref[...] = a3


def _round_up(v, m):
    return ((v + m - 1) // m) * m


def _pad2d(a, rows, cols):
    r, c = a.shape
    return jnp.pad(a, ((0, rows - r), (0, cols - c)))


def lenet300_forward(x, params, seed=0, tile_b=256):
    """x: (B, 1, 28, 28) or (B, 784) float32. Returns (B, num_classes) float32."""
    w1, b1, w2, b2, w3, b3 = params
    num_classes = w3.shape[1]
    assert num_classes <= 128

    B = x.shape[0]
    x2 = x.reshape(B, 784).astype(jnp.float32)

    # Batch tiling: (8,128)-aligned, padded up to a tile multiple.
    tile_b = min(int(tile_b), _round_up(B, 8))
    b_pad = _round_up(B, tile_b)
    if b_pad != B:
        x2 = jnp.pad(x2, ((0, b_pad - B), (0, 0)))
    n_tiles = b_pad // tile_b

    # Lane-pad hidden/output dims to multiples of 128, cast weights to bf16,
    # and fold the inverted-dropout 1/keep scale into the consuming weights.
    inv_keep = jnp.float32(1.0 / KEEP)
    w1p = _pad2d(w1.astype(jnp.float32) * inv_keep, 784, 384).astype(jnp.bfloat16)
    w2p = _pad2d(w2.astype(jnp.float32) * inv_keep, 384, 128).astype(jnp.bfloat16)
    w3p = _pad2d(w3.astype(jnp.float32) * inv_keep, 128, 128).astype(jnp.bfloat16)
    b1p = _pad2d(b1.astype(jnp.float32), 1, 384)
    b2p = _pad2d(b2.astype(jnp.float32), 1, 128)
    b3p = _pad2d(b3.astype(jnp.float32), 1, 128)

    kernel = functools.partial(lenet300_kernel, tile_b, int(seed))
    const = lambda i: (0, 0)

    out = pl.pallas_call(
        kernel,
        out_shape=jax.ShapeDtypeStruct((b_pad, 128), jnp.float32),
        grid=(n_tiles,),
        in_specs=[
            pl.BlockSpec((tile_b, 784), lambda i: (i, 0)),   # x tile
            pl.BlockSpec((784, 384), const),                 # w1 (resident)
            pl.BlockSpec((1, 384), const),                   # b1
            pl.BlockSpec((384, 128), const),                 # w2
            pl.BlockSpec((1, 128), const),                   # b2
            pl.BlockSpec((128, 128), const),                 # w3
            pl.BlockSpec((1, 128), const),                   # b3
        ],
        out_specs=pl.BlockSpec((tile_b, 128), lambda i: (i, 0)),
        compiler_params=pltpu.CompilerParams(
            dimension_semantics=("parallel",)),
    )(x2, w1p, b1p, w2p, b2p, w3p, b3p)

    return out[:B, :num_classes]


def init_params(key, num_classes=10):
    """Deterministic PyTorch-style (uniform +-1/sqrt(fan_in)) init."""
    dims = [(784, 300), (300, 100), (100, num_classes)]
    params = []
    for fan_in, fan_out in dims:
        key, kw, kb = jax.random.split(key, 3)
        bound = 1.0 / math.sqrt(fan_in)
        w = jax.random.uniform(kw, (fan_in, fan_out), jnp.float32, -bound, bound)
        b = jax.random.uniform(kb, (1, fan_out), jnp.float32, -bound, bound)
        params += [w, b]
    return params


if __name__ == "__main__":
    key = jax.random.PRNGKey(0)
    key, kx, kp = jax.random.split(key, 3)

    params = init_params(kp, num_classes=10)
    x = jax.random.normal(kx, (8, 1, 28, 28), dtype=jnp.float32)  # MNIST-like NCHW

    out = lenet300_forward(x, params, seed=0)
    out = jax.block_until_ready(out)

    assert out.shape == (8, 10) and out.dtype == jnp.float32
    assert bool(jnp.all(jnp.isfinite(out)))
    print("KERNEL_OK")
</pallas_src>

<mosaic_0001>
module attributes {stable_mosaic.version = 11 : i64} {
  func.func @lenet300_kernel(%arg0: i32, %arg1: memref<8x784xf32, #tpu.memory_space<vmem>>, %arg2: memref<784x384xbf16, #tpu.memory_space<vmem>>, %arg3: memref<1x384xf32, #tpu.memory_space<vmem>>, %arg4: memref<384x128xbf16, #tpu.memory_space<vmem>>, %arg5: memref<1x128xf32, #tpu.memory_space<vmem>>, %arg6: memref<128x128xbf16, #tpu.memory_space<vmem>>, %arg7: memref<1x128xf32, #tpu.memory_space<vmem>>, %arg8: memref<8x128xf32, #tpu.memory_space<vmem>>) attributes {dimension_semantics = [#tpu.dimension_semantics<parallel>], iteration_bounds = array<i64: 1>, scalar_prefetch = 0 : i64, scratch_operands = 0 : i64, tpu.core_type = #tpu.core_type<tc>, window_params = [{transform_indices = @transform_0, window_bounds = array<i64: 8, 784>}, {pipeline_mode = #tpu.pipeline_mode<synchronous>, transform_indices = @transform_1, window_bounds = array<i64: 784, 384>}, {pipeline_mode = #tpu.pipeline_mode<synchronous>, transform_indices = @transform_2, window_bounds = array<i64: 1, 384>}, {pipeline_mode = #tpu.pipeline_mode<synchronous>, transform_indices = @transform_3, window_bounds = array<i64: 384, 128>}, {pipeline_mode = #tpu.pipeline_mode<synchronous>, transform_indices = @transform_4, window_bounds = array<i64: 1, 128>}, {pipeline_mode = #tpu.pipeline_mode<synchronous>, transform_indices = @transform_5, window_bounds = array<i64: 128, 128>}, {pipeline_mode = #tpu.pipeline_mode<synchronous>, transform_indices = @transform_6, window_bounds = array<i64: 1, 128>}, {transform_indices = @transform_7, window_bounds = array<i64: 8, 128>}]} {
    %c8_i32 = arith.constant 8 : i32
    %0 = arith.muli %arg0, %c8_i32 : i32
    %c0 = arith.constant 0 : index
    %c0_0 = arith.constant 0 : index
    %1 = vector.load %arg1[%c0, %c0_0] : memref<8x784xf32, #tpu.memory_space<vmem>>, vector<8x784xf32>
    %2 = tpu.iota {dimensions = array<i32: 0>} : vector<8x784xi32>
    %3 = vector.broadcast %0 : i32 to vector<8x784xi32>
    %4 = arith.addi %2, %3 : vector<8x784xi32>
    %5 = tpu.iota {dimensions = array<i32: 1>} : vector<8x784xi32>
    %c-1640531535_i32 = arith.constant -1640531535 : i32
    %6 = vector.broadcast %c-1640531535_i32 : i32 to vector<8x784xi32>
    %7 = arith.muli %4, %6 : vector<8x784xi32>
    %c-1028477387_i32 = arith.constant -1028477387 : i32
    %8 = vector.broadcast %c-1028477387_i32 : i32 to vector<8x784xi32>
    %9 = arith.addi %7, %8 : vector<8x784xi32>
    %c-2048144789_i32 = arith.constant -2048144789 : i32
    %10 = vector.broadcast %c-2048144789_i32 : i32 to vector<8x784xi32>
    %11 = arith.muli %5, %10 : vector<8x784xi32>
    %12 = arith.xori %9, %11 : vector<8x784xi32>
    %c16_i32 = arith.constant 16 : i32
    %13 = vector.broadcast %c16_i32 : i32 to vector<8x784xi32>
    %14 = arith.shrsi %12, %13 : vector<8x784xi32>
    %c65535_i32 = arith.constant 65535 : i32
    %15 = vector.broadcast %c65535_i32 : i32 to vector<8x784xi32>
    %16 = arith.andi %14, %15 : vector<8x784xi32>
    %17 = arith.xori %12, %16 : vector<8x784xi32>
    %c-2048144789_i32_1 = arith.constant -2048144789 : i32
    %18 = vector.broadcast %c-2048144789_i32_1 : i32 to vector<8x784xi32>
    %19 = arith.muli %17, %18 : vector<8x784xi32>
    %c13_i32 = arith.constant 13 : i32
    %20 = vector.broadcast %c13_i32 : i32 to vector<8x784xi32>
    %21 = arith.shrsi %19, %20 : vector<8x784xi32>
    %c524287_i32 = arith.constant 524287 : i32
    %22 = vector.broadcast %c524287_i32 : i32 to vector<8x784xi32>
    %23 = arith.andi %21, %22 : vector<8x784xi32>
    %24 = arith.xori %19, %23 : vector<8x784xi32>
    %c-1028477387_i32_2 = arith.constant -1028477387 : i32
    %25 = vector.broadcast %c-1028477387_i32_2 : i32 to vector<8x784xi32>
    %26 = arith.muli %24, %25 : vector<8x784xi32>
    %c16_i32_3 = arith.constant 16 : i32
    %27 = vector.broadcast %c16_i32_3 : i32 to vector<8x784xi32>
    %28 = arith.shrsi %26, %27 : vector<8x784xi32>
    %c65535_i32_4 = arith.constant 65535 : i32
    %29 = vector.broadcast %c65535_i32_4 : i32 to vector<8x784xi32>
    %30 = arith.andi %28, %29 : vector<8x784xi32>
    %31 = arith.xori %26, %30 : vector<8x784xi32>
    %c16777215_i32 = arith.constant 16777215 : i32
    %32 = vector.broadcast %c16777215_i32 : i32 to vector<8x784xi32>
    %33 = arith.andi %31, %32 : vector<8x784xi32>
    %c4194304_i32 = arith.constant 4194304 : i32
    %34 = vector.broadcast %c4194304_i32 : i32 to vector<8x784xi32>
    %35 = arith.cmpi sge, %33, %34 : vector<8x784xi32>
    %cst = arith.constant 0.000000e+00 : f32
    %36 = vector.broadcast %cst : f32 to vector<8x784xf32>
    %37 = arith.select %35, %1, %36 : vector<8x784xi1>, vector<8x784xf32>
    %38 = arith.truncf %37 : vector<8x784xf32> to vector<8x784xbf16>
    %c0_5 = arith.constant 0 : index
    %c0_6 = arith.constant 0 : index
    %39 = vector.load %arg2[%c0_5, %c0_6] : memref<784x384xbf16, #tpu.memory_space<vmem>>, vector<784x384xbf16>
    %cst_7 = arith.constant dense<0.000000e+00> : vector<8x384xf32>
    %40 = tpu.matmul %38, %39, %cst_7 {dimension_numbers = #tpu.dot_dimension_numbers<[1], [0], [0], [1], [0, 0, 1, 1], [], []>} : vector<8x784xbf16>, vector<784x384xbf16>, vector<8x384xf32> -> vector<8x384xf32>
    %c0_8 = arith.constant 0 : index
    %c0_9 = arith.constant 0 : index
    %41 = vector.load %arg3[%c0_8, %c0_9] : memref<1x384xf32, #tpu.memory_space<vmem>>, vector<1x384xf32>
    %42 = vector.broadcast %41 : vector<1x384xf32> to vector<8x384xf32>
    %43 = arith.addf %40, %42 : vector<8x384xf32>
    %cst_10 = arith.constant 0.000000e+00 : f32
    %44 = vector.broadcast %cst_10 : f32 to vector<8x384xf32>
    %45 = arith.maximumf %43, %44 : vector<8x384xf32>
    %46 = tpu.iota {dimensions = array<i32: 0>} : vector<8x384xi32>
    %47 = vector.broadcast %0 : i32 to vector<8x384xi32>
    %48 = arith.addi %46, %47 : vector<8x384xi32>
    %49 = tpu.iota {dimensions = array<i32: 1>} : vector<8x384xi32>
    %c-1640531535_i32_11 = arith.constant -1640531535 : i32
    %50 = vector.broadcast %c-1640531535_i32_11 : i32 to vector<8x384xi32>
    %51 = arith.muli %48, %50 : vector<8x384xi32>
    %c-2056954774_i32 = arith.constant -2056954774 : i32
    %52 = vector.broadcast %c-2056954774_i32 : i32 to vector<8x384xi32>
    %53 = arith.addi %51, %52 : vector<8x384xi32>
    %c-2048144789_i32_12 = arith.constant -2048144789 : i32
    %54 = vector.broadcast %c-2048144789_i32_12 : i32 to vector<8x384xi32>
    %55 = arith.muli %49, %54 : vector<8x384xi32>
    %56 = arith.xori %53, %55 : vector<8x384xi32>
    %c16_i32_13 = arith.constant 16 : i32
    %57 = vector.broadcast %c16_i32_13 : i32 to vector<8x384xi32>
    %58 = arith.shrsi %56, %57 : vector<8x384xi32>
    %c65535_i32_14 = arith.constant 65535 : i32
    %59 = vector.broadcast %c65535_i32_14 : i32 to vector<8x384xi32>
    %60 = arith.andi %58, %59 : vector<8x384xi32>
    %61 = arith.xori %56, %60 : vector<8x384xi32>
    %c-2048144789_i32_15 = arith.constant -2048144789 : i32
    %62 = vector.broadcast %c-2048144789_i32_15 : i32 to vector<8x384xi32>
    %63 = arith.muli %61, %62 : vector<8x384xi32>
    %c13_i32_16 = arith.constant 13 : i32
    %64 = vector.broadcast %c13_i32_16 : i32 to vector<8x384xi32>
    %65 = arith.shrsi %63, %64 : vector<8x384xi32>
    %c524287_i32_17 = arith.constant 524287 : i32
    %66 = vector.broadcast %c524287_i32_17 : i32 to vector<8x384xi32>
    %67 = arith.andi %65, %66 : vector<8x384xi32>
    %68 = arith.xori %63, %67 : vector<8x384xi32>
    %c-1028477387_i32_18 = arith.constant -1028477387 : i32
    %69 = vector.broadcast %c-1028477387_i32_18 : i32 to vector<8x384xi32>
    %70 = arith.muli %68, %69 : vector<8x384xi32>
    %c16_i32_19 = arith.constant 16 : i32
    %71 = vector.broadcast %c16_i32_19 : i32 to vector<8x384xi32>
    %72 = arith.shrsi %70, %71 : vector<8x384xi32>
    %c65535_i32_20 = arith.constant 65535 : i32
    %73 = vector.broadcast %c65535_i32_20 : i32 to vector<8x384xi32>
    %74 = arith.andi %72, %73 : vector<8x384xi32>
    %75 = arith.xori %70, %74 : vector<8x384xi32>
    %c16777215_i32_21 = arith.constant 16777215 : i32
    %76 = vector.broadcast %c16777215_i32_21 : i32 to vector<8x384xi32>
    %77 = arith.andi %75, %76 : vector<8x384xi32>
    %c4194304_i32_22 = arith.constant 4194304 : i32
    %78 = vector.broadcast %c4194304_i32_22 : i32 to vector<8x384xi32>
    %79 = arith.cmpi sge, %77, %78 : vector<8x384xi32>
    %cst_23 = arith.constant 0.000000e+00 : f32
    %80 = vector.broadcast %cst_23 : f32 to vector<8x384xf32>
    %81 = arith.select %79, %45, %80 : vector<8x384xi1>, vector<8x384xf32>
    %82 = arith.truncf %81 : vector<8x384xf32> to vector<8x384xbf16>
    %c0_24 = arith.constant 0 : index
    %c0_25 = arith.constant 0 : index
    %83 = vector.load %arg4[%c0_24, %c0_25] : memref<384x128xbf16, #tpu.memory_space<vmem>>, vector<384x128xbf16>
    %cst_26 = arith.constant dense<0.000000e+00> : vector<8x128xf32>
    %84 = tpu.matmul %82, %83, %cst_26 {dimension_numbers = #tpu.dot_dimension_numbers<[1], [0], [0], [1], [0, 0, 1, 1], [], []>} : vector<8x384xbf16>, vector<384x128xbf16>, vector<8x128xf32> -> vector<8x128xf32>
    %c0_27 = arith.constant 0 : index
    %c0_28 = arith.constant 0 : index
    %85 = vector.load %arg5[%c0_27, %c0_28] : memref<1x128xf32, #tpu.memory_space<vmem>>, vector<1x128xf32>
    %86 = vector.broadcast %85 : vector<1x128xf32> to vector<8x128xf32>
    %87 = arith.addf %84, %86 : vector<8x128xf32>
    %cst_29 = arith.constant 0.000000e+00 : f32
    %88 = vector.broadcast %cst_29 : f32 to vector<8x128xf32>
    %89 = arith.maximumf %87, %88 : vector<8x128xf32>
    %90 = tpu.iota {dimensions = array<i32: 0>} : vector<8x128xi32>
    %91 = vector.broadcast %0 : i32 to vector<8x128xi32>
    %92 = arith.addi %90, %91 : vector<8x128xi32>
    %93 = tpu.iota {dimensions = array<i32: 1>} : vector<8x128xi32>
    %c-1640531535_i32_30 = arith.constant -1640531535 : i32
    %94 = vector.broadcast %c-1640531535_i32_30 : i32 to vector<8x128xi32>
    %95 = arith.muli %92, %94 : vector<8x128xi32>
    %c1209535135_i32 = arith.constant 1209535135 : i32
    %96 = vector.broadcast %c1209535135_i32 : i32 to vector<8x128xi32>
    %97 = arith.addi %95, %96 : vector<8x128xi32>
    %c-2048144789_i32_31 = arith.constant -2048144789 : i32
    %98 = vector.broadcast %c-2048144789_i32_31 : i32 to vector<8x128xi32>
    %99 = arith.muli %93, %98 : vector<8x128xi32>
    %100 = arith.xori %97, %99 : vector<8x128xi32>
    %c16_i32_32 = arith.constant 16 : i32
    %101 = vector.broadcast %c16_i32_32 : i32 to vector<8x128xi32>
    %102 = arith.shrsi %100, %101 : vector<8x128xi32>
    %c65535_i32_33 = arith.constant 65535 : i32
    %103 = vector.broadcast %c65535_i32_33 : i32 to vector<8x128xi32>
    %104 = arith.andi %102, %103 : vector<8x128xi32>
    %105 = arith.xori %100, %104 : vector<8x128xi32>
    %c-2048144789_i32_34 = arith.constant -2048144789 : i32
    %106 = vector.broadcast %c-2048144789_i32_34 : i32 to vector<8x128xi32>
    %107 = arith.muli %105, %106 : vector<8x128xi32>
    %c13_i32_35 = arith.constant 13 : i32
    %108 = vector.broadcast %c13_i32_35 : i32 to vector<8x128xi32>
    %109 = arith.shrsi %107, %108 : vector<8x128xi32>
    %c524287_i32_36 = arith.constant 524287 : i32
    %110 = vector.broadcast %c524287_i32_36 : i32 to vector<8x128xi32>
    %111 = arith.andi %109, %110 : vector<8x128xi32>
    %112 = arith.xori %107, %111 : vector<8x128xi32>
    %c-1028477387_i32_37 = arith.constant -1028477387 : i32
    %113 = vector.broadcast %c-1028477387_i32_37 : i32 to vector<8x128xi32>
    %114 = arith.muli %112, %113 : vector<8x128xi32>
    %c16_i32_38 = arith.constant 16 : i32
    %115 = vector.broadcast %c16_i32_38 : i32 to vector<8x128xi32>
    %116 = arith.shrsi %114, %115 : vector<8x128xi32>
    %c65535_i32_39 = arith.constant 65535 : i32
    %117 = vector.broadcast %c65535_i32_39 : i32 to vector<8x128xi32>
    %118 = arith.andi %116, %117 : vector<8x128xi32>
    %119 = arith.xori %114, %118 : vector<8x128xi32>
    %c16777215_i32_40 = arith.constant 16777215 : i32
    %120 = vector.broadcast %c16777215_i32_40 : i32 to vector<8x128xi32>
    %121 = arith.andi %119, %120 : vector<8x128xi32>
    %c4194304_i32_41 = arith.constant 4194304 : i32
    %122 = vector.broadcast %c4194304_i32_41 : i32 to vector<8x128xi32>
    %123 = arith.cmpi sge, %121, %122 : vector<8x128xi32>
    %cst_42 = arith.constant 0.000000e+00 : f32
    %124 = vector.broadcast %cst_42 : f32 to vector<8x128xf32>
    %125 = arith.select %123, %89, %124 : vector<8x128xi1>, vector<8x128xf32>
    %126 = arith.truncf %125 : vector<8x128xf32> to vector<8x128xbf16>
    %c0_43 = arith.constant 0 : index
    %c0_44 = arith.constant 0 : index
    %127 = vector.load %arg6[%c0_43, %c0_44] : memref<128x128xbf16, #tpu.memory_space<vmem>>, vector<128x128xbf16>
    %cst_45 = arith.constant dense<0.000000e+00> : vector<8x128xf32>
    %128 = tpu.matmul %126, %127, %cst_45 {dimension_numbers = #tpu.dot_dimension_numbers<[1], [0], [0], [1], [0, 0, 1, 1], [], []>} : vector<8x128xbf16>, vector<128x128xbf16>, vector<8x128xf32> -> vector<8x128xf32>
    %c0_46 = arith.constant 0 : index
    %c0_47 = arith.constant 0 : index
    %129 = vector.load %arg7[%c0_46, %c0_47] : memref<1x128xf32, #tpu.memory_space<vmem>>, vector<1x128xf32>
    %130 = vector.broadcast %129 : vector<1x128xf32> to vector<8x128xf32>
    %131 = arith.addf %128, %130 : vector<8x128xf32>
    %c0_48 = arith.constant 0 : index
    %c0_49 = arith.constant 0 : index
    %132 = vector.load %arg8[%c0_48, %c0_49] : memref<8x128xf32, #tpu.memory_space<vmem>>, vector<8x128xf32>
    tpu.vector_store %arg8[%c0_48, %c0_49], %131 {strides = array<i32>} : memref<8x128xf32, #tpu.memory_space<vmem>>, vector<8x128xf32>,
    return
  }
  func.func @transform_0(%arg0: i32) -> (i32, i32) {
    %c0_i32 = arith.constant 0 : i32
    %c0_i32_0 = arith.constant 0 : i32
    return %arg0, %c0_i32 : i32, i32
  }
  func.func @transform_1(%arg0: i32) -> (i32, i32) {
    %c0_i32 = arith.constant 0 : i32
    %c0_i32_0 = arith.constant 0 : i32
    %c0_i32_1 = arith.constant 0 : i32
    return %c0_i32, %c0_i32_0 : i32, i32
  }
  func.func @transform_2(%arg0: i32) -> (i32, i32) {
    %c0_i32 = arith.constant 0 : i32
    %c0_i32_0 = arith.constant 0 : i32
    %c0_i32_1 = arith.constant 0 : i32
    return %c0_i32, %c0_i32_0 : i32, i32
  }
  func.func @transform_3(%arg0: i32) -> (i32, i32) {
    %c0_i32 = arith.constant 0 : i32
    %c0_i32_0 = arith.constant 0 : i32
    %c0_i32_1 = arith.constant 0 : i32
    return %c0_i32, %c0_i32_0 : i32, i32
  }
  func.func @transform_4(%arg0: i32) -> (i32, i32) {
    %c0_i32 = arith.constant 0 : i32
    %c0_i32_0 = arith.constant 0 : i32
    %c0_i32_1 = arith.constant 0 : i32
    return %c0_i32, %c0_i32_0 : i32, i32
  }
  func.func @transform_5(%arg0: i32) -> (i32, i32) {
    %c0_i32 = arith.constant 0 : i32
    %c0_i32_0 = arith.constant 0 : i32
    %c0_i32_1 = arith.constant 0 : i32
    return %c0_i32, %c0_i32_0 : i32, i32
  }
  func.func @transform_6(%arg0: i32) -> (i32, i32) {
    %c0_i32 = arith.constant 0 : i32
    %c0_i32_0 = arith.constant 0 : i32
    %c0_i32_1 = arith.constant 0 : i32
    return %c0_i32, %c0_i32_0 : i32, i32
  }
  func.func @transform_7(%arg0: i32) -> (i32, i32) {
    %c0_i32 = arith.constant 0 : i32
    %c0_i32_0 = arith.constant 0 : i32
    return %arg0, %c0_i32 : i32, i32
  }
}

</mosaic_0001>

<bundles_post_ra>
// kernel: tpu_custom_call.1
= control target key start
LH: loop header
LB: loop body
LE: loop exit
PB: predicated region body
PF: predicated region fallthrough
CT: control target
= control target key end

     0   :  { %12 = vsyncpa [#allocation3], 0  ;;  %s3092_s0 = inlined_call_operand.hbm [shape: f32[8,784], index: 0, kind: input, shape index: {}]   ;;  %s3093_s1 = inlined_call_operand.hbm [shape: bf16[784,384], index: 1, kind: input, shape index: {}]   ;;  %s3094_s2 = inlined_call_operand.vmem [shape: f32[1,384], index: 2, kind: input, shape index: {}]   ;;  %s3095_s3 = inlined_call_operand.hbm [shape: bf16[384,128], index: 3, kind: input, shape index: {}]   ;;  %s3096_s4 = inlined_call_operand.vmem [shape: f32[1,128], index: 4, kind: input, shape index: {}]   ;;  %s3097_s5 = inlined_call_operand.hbm [shape: bf16[128,128], index: 5, kind: input, shape index: {}]   ;;  %s3098_s6 = inlined_call_operand.vmem [shape: f32[1,128], index: 6, kind: input, shape index: {}]   ;;  %s3099_s7 = inlined_call_operand.hbm [shape: f32[8,128], index: 7, kind: output, shape index: {}]  }
   0x1   :  { %13 = vsyncpa [#allocation6], 0 }
   0x2   :  { %14 = vsyncpa [#allocation9], 0 }
   0x3   :  { %15 = vsyncpa [#allocation4], 0  ;;  %s2791_s24 = smov [#allocation5]  }
   0x4   :  { %s31_s25 = sshll.u32 %s2791_s24, 4  ;;  %s32_s25 = int_to_ptr.vmem [resolvable:$true] %s31_s25 }
   0x5   :  { %s2691_s26 = scalar_lea.vmem %s32_s25, 18816  ;;  %p2696_p1 = scmp.lt.s32.totalorder %s32_s25, %s32_s25 }
   0x6   :  { %p2692_p0 = scmp.ne.s32.totalorder %s32_s25, %s2691_s26  ;;  %p2697_p2 = scmp.lt.s32.totalorder %s2691_s26, %s2691_s26 }
   0x8   :  { %p2698_p3 = por %p2697_p2, %p2696_p1 }
   0xa   :  { %p2699_p4 = pnand %p2698_p3, %p2692_p0 }
   0xc   :  { %2702 = shalt.err (!%p2699_p4)
}
   0xd   :  { %s2792_s27 = smov 192   ;;  %s2793_s28 = smov 12  }
   0xe   :  { %37 = dma.hbm_to_vmem [thread:$0]  %s3093_s1, 18816, %s32_s25, [#allocation6], %s2792_s27, %s2792_s27, %s2793_s28  }
   0xf   :  { %s2794_s8 = smov [#allocation2]   ;;  %s2795_s10 = smov [#allocation7]  }
  0x10   :  { %s22_s9 = sshll.u32 %s2794_s8, 4  ;;  %s45_s11 = sshll.u32 %s2795_s10, 4  ;;  %s23_s9 = int_to_ptr.vmem [resolvable:$true] %s22_s9  ;;  %s46_s11 = int_to_ptr.vmem [resolvable:$true] %s45_s11 }
  0x11   :  { %s2711_s12 = scalar_lea.vmem %s23_s9, 896  ;;  %p2716_p6 = scmp.lt.s32.totalorder %s23_s9, %s23_s9 }
  0x12   :  { %p2712_p5 = scmp.ne.s32.totalorder %s23_s9, %s2711_s12  ;;  %p2717_p7 = scmp.lt.s32.totalorder %s2711_s12, %s2711_s12 }
  0x14   :  { %p2718_p8 = por %p2717_p7, %p2716_p6 }
  0x16   :  { %p2719_p9 = pnand %p2718_p8, %p2712_p5 }
  0x18   :  { %2722 = shalt.err (!%p2719_p9)
}
  0x19   :  { %25 = dma.hbm_to_vmem [thread:$0]  %s3092_s0, 896, %s23_s9, [#allocation3]  }
  0x1a   :  { %s2731_s15 = scalar_lea.vmem %s46_s11, 3072  ;;  %p2736_p11 = scmp.lt.s32.totalorder %s46_s11, %s46_s11 }
  0x1b   :  { %p2732_p10 = scmp.ne.s32.totalorder %s46_s11, %s2731_s15  ;;  %p2737_p12 = scmp.lt.s32.totalorder %s2731_s15, %s2731_s15 }
  0x1d   :  { %p2738_p13 = por %p2737_p12, %p2736_p11 }
  0x1f   :  { %p2739_p0 = pnand %p2738_p13, %p2732_p10 }
  0x21   :  { %2742 = shalt.err (!%p2739_p0)
}
  0x22   :  { %s2796_s1 = smov 64   ;;  %s2797_s16 = smov 4  }
  0x23   :  { %51 = dma.hbm_to_vmem [thread:$0]  %s3095_s3, 3072, %s46_s11, [#allocation6], %s2796_s1, %s2796_s1, %s2797_s16  }
  0x24   :  { %s2798_s19 = smov [#allocation8]  }
  0x25   :  { %s59_s20 = sshll.u32 %s2798_s19, 4  ;;  %s60_s20 = int_to_ptr.vmem [resolvable:$true] %s59_s20 }
  0x26   :  { %s2751_s21 = scalar_lea.vmem %s60_s20, 1024  ;;  %p2756_p2 = scmp.lt.s32.totalorder %s60_s20, %s60_s20 }
  0x27   :  { %p2752_p1 = scmp.ne.s32.totalorder %s60_s20, %s2751_s21  ;;  %p2757_p3 = scmp.lt.s32.totalorder %s2751_s21, %s2751_s21 }
  0x29   :  { %p2758_p4 = por %p2757_p3, %p2756_p2 }
  0x2b   :  { %p2759_p5 = pnand %p2758_p4, %p2752_p1 }
  0x2d   :  { %2762 = shalt.err (!%p2759_p5)
}
  0x2e   :  { %65 = dma.hbm_to_vmem [thread:$0]  %s3097_s5, 1024, %s60_s20, [#allocation9], %s2796_s1, %s2796_s1, %s2797_s16  }
  0x2f   :  { %2783 = dma.done.wait [#allocation3], 896  }
  0x30   :  { %2784 = vsyncadd [#allocation3], 4294966400 }
  0x31   :  { %2785 = dma.done.wait [#allocation6], 21888  }
  0x32   :  { %2786 = vsyncadd [#allocation6], 4294945408 }
  0x33   :  { %2787 = dma.done.wait [#allocation9], 1024  }
  0x34   :  { %2788 = vsyncadd [#allocation9], 4294966272  ;;  %v89_v0 = vlaneseq  ;;  %v2455_v9 = vld [vmem:[#allocation5 + $0xac] ss:$12 sps:$4 sm:$0xff]   ;;  %v2457_v10 = vld [vmem:[#allocation5 + $0xa8] ss:$12 sps:$4 sm:$0xff]  }
  0x35   :  { %1223 = vmatprep.subr.bf16.mxu0 %v2455_v9  ;;  %v2458_v12 = vld [vmem:[#allocation5 + $0x22c] ss:$12 sps:$4 sm:$0xff]   ;;  %v2460_v13 = vld [vmem:[#allocation5 + $0x228] ss:$12 sps:$4 sm:$0xff]   ;;  %v2463_v16 = vld [vmem:[#allocation5 + $0x90] ss:$12 sps:$4 sm:$0xff]  }
  0x36   :  { %v2855_v1 = vshrl.u32 %v89_v0, 7  ;;  %v2857_v2 = vand.u32 127, %v89_v0  ;;  %1224 = vmatpush1.bf16.msra.mxu0 %v2457_v10  ;;  %v2461_v15 = vld [vmem:[#allocation5 + $0x94] ss:$12 sps:$4 sm:$0xff]   ;;  %1264 = vmatprep.subr.bf16.mxu1 %v2458_v12  ;;  %v2466_v19 = vld [vmem:[#allocation5 + $0x210] ss:$12 sps:$4 sm:$0xff]  }
  0x37   :  { %v2464_v18 = vld [vmem:[#allocation5 + $0x214] ss:$12 sps:$4 sm:$0xff]   ;;  %1265 = vmatpush1.bf16.msra.mxu1 %v2460_v13  ;;  %1225 = vmatprep.subr.bf16.mxu0 %v2461_v15  ;;  %v2467_v21 = vld [vmem:[#allocation5 + $0x7c] ss:$12 sps:$4 sm:$0xff]   ;;  %v2469_v24 = vld [vmem:[#allocation5 + $0x78] ss:$12 sps:$4 sm:$0xff]  }
  0x38   :  { %v2860_v3 = vadd.s32 128, %v2857_v2  ;;  %v2863_v4 = vmul.u32 2654435761, %v2855_v1  ;;  %v97_v5 = vadd.s32 384, %v2857_v2  ;;  %v2875_v20 = vadd.s32 256, %v2857_v2  ;;  %1266 = vmatprep.subr.bf16.mxu1 %v2464_v18  ;;  %s2802_s26 = smov [#allocation10]  }
  0x39   :  { %v2878_v22 = vmul.u32 2246822507, %v2857_v2  ;;  %v2470_v25 = vld [vmem:[#allocation5 + $0x1fc] ss:$12 sps:$4 sm:$0xff]   ;;  %v2473_v27 = vld [vmem:[#allocation5 + $0x64] ss:$12 sps:$4 sm:$0xff]  }
  0x3a   :  { %v2867_v6 = vadd.s32 3266489909, %v2863_v4  ;;  %v104_v7 = vmul.u32 2246822507, %v2860_v3  ;;  %v106_v8 = vmul.u32 2246822507, %v97_v5  ;;  %1226 = vmatpush1.bf16.msra.mxu0 %v2463_v16 }
  0x3b   :  { %1227 = vmatprep.subr.bf16.mxu0 %v2467_v21  ;;  %1267 = vmatpush1.bf16.msra.mxu1 %v2466_v19  ;;  %v2472_v28 = vld [vmem:[#allocation5 + $0x1f8] ss:$12 sps:$4 sm:$0xff]   ;;  %v105_v29 = vmul.u32 2246822507, %v2875_v20  ;;  %v2475_v33 = vld [vmem:[#allocation5 + $0x60] ss:$12 sps:$4 sm:$0xff]  }
  0x3c   :  { %v111_v11 = vxor.u32 %v104_v7, %v2867_v6  ;;  %v113_v14 = vxor.u32 %v106_v8, %v2867_v6  ;;  %1268 = vmatprep.subr.bf16.mxu1 %v2470_v25  ;;  %v2476_v30 = vld [vmem:[#allocation5 + $0x1e4] ss:$12 sps:$4 sm:$0xff]   ;;  %v110_v31 = vxor.u32 %v2878_v22, %v2867_v6  ;;  %v2479_v35 = vld [vmem:[#allocation5 + $0x4c] ss:$12 sps:$4 sm:$0xff]   ;;  %v2481_v41 = vld [vmem:[#allocation5 + $0x48] ss:$12 sps:$4 sm:$0xff]  }
  0x3d   :  { %v2478_v36 = vld [vmem:[#allocation5 + $0x1e0] ss:$12 sps:$4 sm:$0xff]   ;;  %v112_v37 = vxor.u32 %v105_v29, %v2867_v6  ;;  %v2484_v44 = vld [vmem:[#allocation5 + $0x1c8] ss:$12 sps:$4 sm:$0xff]   ;;  %v2487_v49 = vld [vmem:[#allocation5 + $0x30] ss:$12 sps:$4 sm:$0xff]  }
  0x3e   :  { %v2026_v17 = vshrl.u32 %v111_v11, 16  ;;  %v2028_v23 = vshrl.u32 %v113_v14, 16  ;;  %1228 = vmatpush1.bf16.msra.mxu0 %v2469_v24  ;;  %v2482_v38 = vld [vmem:[#allocation5 + $0x1cc] ss:$12 sps:$4 sm:$0xff]   ;;  %v2025_v39 = vshrl.u32 %v110_v31, 16  ;;  %v99_v10 = vadd.s32 640, %v2857_v2 }
  0x3f   :  { %1229 = vmatprep.subr.bf16.mxu0 %v2473_v27  ;;  %1269 = vmatpush1.bf16.msra.mxu1 %v2472_v28  ;;  %v2485_v43 = vld [vmem:[#allocation5 + $0x34] ss:$12 sps:$4 sm:$0xff]   ;;  %v2027_v45 = vshrl.u32 %v112_v37, 16  ;;  %v2491_v51 = vld [vmem:[#allocation5 + $0x1c] ss:$12 sps:$4 sm:$0xff]   ;;  %v98_v13 = vadd.s32 512, %v2857_v2 }
  0x40   :  { %v132_v26 = vxor.u32 %v2026_v17, %v111_v11  ;;  %v134_v32 = vxor.u32 %v2028_v23, %v113_v14  ;;  %1270 = vmatprep.subr.bf16.mxu1 %v2476_v30  ;;  %v2488_v46 = vld [vmem:[#allocation5 + $0x1b4] ss:$12 sps:$4 sm:$0xff]   ;;  %v131_v47 = vxor.u32 %v2025_v39, %v110_v31  ;;  %v2490_v52 = vld [vmem:[#allocation5 + $0x1b0] ss:$12 sps:$4 sm:$0xff]   ;;  %v2493_v57 = vld [vmem:[#allocation5 + $0x18] ss:$12 sps:$4 sm:$0xff]  }
  0x41   :  { %v133_v53 = vxor.u32 %v2027_v45, %v112_v37  ;;  %v2494_v54 = vld [vmem:[#allocation5 + $0x19c] ss:$12 sps:$4 sm:$0xff]   ;;  %v2497_v59 = vld [vmem:[#allocation5 + $0x4] ss:$12 sps:$4 sm:$0xff]   ;;  %v2499_v5 = vld [vmem:[#allocation5] ss:$12 sps:$4 sm:$0xff]  }
  0x42   :  { %v139_v34 = vmul.u32 2246822507, %v132_v26  ;;  %v141_v40 = vmul.u32 2246822507, %v134_v32  ;;  %1230 = vmatpush1.bf16.msra.mxu0 %v2475_v33  ;;  %v2496_v60 = vld [vmem:[#allocation5 + $0x198] ss:$12 sps:$4 sm:$0xff]  }
  0x43   :  { %1231 = vmatprep.subr.bf16.mxu0 %v2479_v35  ;;  %1271 = vmatpush1.bf16.msra.mxu1 %v2478_v36  ;;  %v138_v55 = vmul.u32 2246822507, %v131_v47  ;;  %v140_v61 = vmul.u32 2246822507, %v133_v53  ;;  %v2500_v62 = vld [vmem:[#allocation5 + $0x184] ss:$12 sps:$4 sm:$0xff]  }
  0x44   :  { %v2033_v42 = vshrl.u32 %v139_v34, 13  ;;  %1272 = vmatprep.subr.bf16.mxu1 %v2482_v38  ;;  %v2035_v48 = vshrl.u32 %v141_v40, 13  ;;  %v2503_v9 = vld [vmem:[#allocation5 + $0x16c] ss:$12 sps:$4 sm:$0xff]   ;;  %v2505_v17 = vld [vmem:[#allocation5 + $0x168] ss:$12 sps:$4 sm:$0xff]  }
  0x45   :  { %v2032_v63 = vshrl.u32 %v138_v55, 13  ;;  %v2502_v11 = vld [vmem:[#allocation5 + $0x180] ss:$12 sps:$4 sm:$0xff]   ;;  %v2034_v12 = vshrl.u32 %v140_v61, 13  ;;  %v100_v19 = vadd.s32 768, %v2857_v2  ;;  %v83_v47 = vld [vmem:[#allocation2 + $0x8] sm:$0xff] }
  0x46   :  { %1232 = vmatpush1.bf16.msra.mxu0 %v2481_v41  ;;  %v160_v50 = vxor.u32 %v2033_v42, %v139_v34  ;;  %v162_v56 = vxor.u32 %v2035_v48, %v141_v40  ;;  %v2506_v14 = vld [vmem:[#allocation5 + $0x2ec] ss:$12 sps:$4 sm:$0xff]   ;;  %v2509_v21 = vld [vmem:[#allocation5 + $0x154] ss:$12 sps:$4 sm:$0xff]   ;;  %v108_v23 = vmul.u32 2246822507, %v99_v10 }
  0x47   :  { %1233 = vmatprep.subr.bf16.mxu0 %v2485_v43  ;;  %1273 = vmatpush1.bf16.msra.mxu1 %v2484_v44  ;;  %v159_v15 = vxor.u32 %v2032_v63, %v138_v55  ;;  %v2508_v24 = vld [vmem:[#allocation5 + $0x2e8] ss:$12 sps:$4 sm:$0xff]   ;;  %v161_v25 = vxor.u32 %v2034_v12, %v140_v61  ;;  %v107_v26 = vmul.u32 2246822507, %v98_v13  ;;  %v2511_v31 = vld [vmem:[#allocation5 + $0x150] ss:$12 sps:$4 sm:$0xff]  }
  0x48   :  { %1274 = vmatprep.subr.bf16.mxu1 %v2488_v46  ;;  %v167_v58 = vmul.u32 3266489909, %v160_v50  ;;  %v169_v0 = vmul.u32 3266489909, %v162_v56  ;;  %v2512_v27 = vld [vmem:[#allocation5 + $0x2d4] ss:$12 sps:$4 sm:$0xff]   ;;  %v115_v45 = vxor.u32 %v108_v23, %v2867_v6 }
  0x49   :  { %v166_v28 = vmul.u32 3266489909, %v159_v15  ;;  %v2890_v33 = vxor.u32 %v107_v26, %v2867_v6  ;;  %v2515_v34 = vld [vmem:[#allocation5 + $0x13c] ss:$12 sps:$4 sm:$0xff]   ;;  %v109_v2 = vmul.u32 2246822507, %v100_v19 }
  0x4a   :  { %1234 = vmatpush1.bf16.msra.mxu0 %v2487_v49  ;;  %v2040_v8 = vshrl.u32 %v167_v58, 16  ;;  %v2042_v16 = vshrl.u32 %v169_v0, 16  ;;  %v2514_v35 = vld [vmem:[#allocation5 + $0x2d0] ss:$12 sps:$4 sm:$0xff]   ;;  %v168_v36 = vmul.u32 3266489909, %v161_v25 }
  0x4b   :  { %1235 = vmatprep.subr.bf16.mxu0 %v2491_v51  ;;  %1275 = vmatpush1.bf16.msra.mxu1 %v2490_v52  ;;  %v2518_v37 = vld [vmem:[#allocation5 + $0x2bc] ss:$12 sps:$4 sm:$0xff]   ;;  %v2893_v39 = vxor.u32 %v109_v2, %v2867_v6  ;;  %v2517_v40 = vld [vmem:[#allocation5 + $0x138] ss:$12 sps:$4 sm:$0xff]   ;;  %v2039_v42 = vshrl.u32 %v166_v28, 16  ;;  %v2907_v51 = vpack.c.bf16 %v83_v47, %v83_v47  ;;  %v2030_v55 = vshrl.u32 %v115_v45, 16 }
  0x4c   :  { %1276 = vmatprep.subr.bf16.mxu1 %v2494_v54  ;;  %v188_v18 = vxor.u32 %v2040_v8, %v167_v58  ;;  %v190_v30 = vxor.u32 %v2042_v16, %v169_v0  ;;  %v2521_v43 = vld [vmem:[#allocation5 + $0x124] ss:$12 sps:$4 sm:$0xff]   ;;  %v2041_v49 = vshrl.u32 %v168_v36, 16  ;;  %v2523_v50 = vld [vmem:[#allocation5 + $0x120] ss:$12 sps:$4 sm:$0xff]   ;;  %v84_v25 = vld [vmem:[#allocation2 + $0x10] sm:$0xff] }
  0x4d   :  { %v2520_v44 = vld [vmem:[#allocation5 + $0x2b8] ss:$12 sps:$4 sm:$0xff]   ;;  %v187_v52 = vxor.u32 %v2039_v42, %v166_v28  ;;  %v2526_v6 = vld [vmem:[#allocation5 + $0x2a0] ss:$12 sps:$4 sm:$0xff]   ;;  %v136_v63 = vxor.u32 %v2030_v55, %v115_v45  ;;  %v2535_v8 = vld [vmem:[#allocation5 + $0xf0] ss:$12 sps:$4 sm:$0xff]  }
  0x4e   :  { %1236 = vmatpush1.bf16.msra.mxu0 %v2493_v57  ;;  %v195_v32 = vand.u32 16777215, %v188_v18  ;;  %v197_v38 = vand.u32 16777215, %v190_v30  ;;  %v2524_v46 = vld [vmem:[#allocation5 + $0x2a4] ss:$12 sps:$4 sm:$0xff]   ;;  %v189_v58 = vxor.u32 %v2041_v49, %v168_v36 }
  0x4f   :  { %1237 = vmatprep.subr.bf16.mxu0 %v2497_v59  ;;  %1277 = vmatpush1.bf16.msra.mxu1 %v2496_v60  ;;  %v2527_v53 = vld [vmem:[#allocation5 + $0x10c] ss:$12 sps:$4 sm:$0xff]   ;;  %v85_v54 = vld [vmem:[#allocation2 + $0x18] sm:$0xff]  ;;  %v2529_v59 = vld [vmem:[#allocation5 + $0x108] ss:$12 sps:$4 sm:$0xff]   ;;  %v2029_v2 = vshrl.u32 %v2890_v33, 16 }
  0x50   :  { %1278 = vmatprep.subr.bf16.mxu1 %v2500_v62  ;;  %vm2895_vm0 = vcmp.ge.s32.totalorder %v195_v32, 4194304  ;;  %vm2903_vm2 = vcmp.ge.s32.totalorder %v197_v38, 4194304  ;;  %v2530_v56 = vld [vmem:[#allocation5 + $0x28c] ss:$12 sps:$4 sm:$0xff]   ;;  %v2918_v57 = vpack.c.bf16 %v85_v54, %v85_v54  ;;  %v194_v60 = vand.u32 16777215, %v187_v52 }
  0x51   :  { %vm2193_vm1 = vmpackc.low %vm2895_vm0, %vm2895_vm0  ;;  %v2533_v61 = vld [vmem:[#allocation5 + $0xf4] ss:$12 sps:$4 sm:$0xff]   ;;  %v2538_v10 = vld [vmem:[#allocation5 + $0x270] ss:$12 sps:$4 sm:$0xff]   ;;  %v2942_v32 = vpack.c.bf16 %v84_v25, %v84_v25  ;;  %v2031_v45 = vshrl.u32 %v2893_v39, 16  ;;  %vm1219_vm13 = vcmask 130048  }
  0x52   :  { %1238 = vmatpush1.bf16.msra.mxu0 %v2499_v5  ;;  %2195 = vmatprep.mubr.msk.bf16.mxu0 %vm2193_vm1, %v2907_v51  ;;  %vm2199_vm3 = vmpackc.low %vm2903_vm2, %vm2903_vm2  ;;  %v2532_v62 = vld [vmem:[#allocation5 + $0x288] ss:$12 sps:$4 sm:$0xff]   ;;  %v196_v5 = vand.u32 16777215, %v189_v58  ;;  %v2541_v12 = vld [vmem:[#allocation5 + $0xd8] ss:$12 sps:$4 sm:$0xff]  }
  0x53   :  { %1239 = vmatprep.subr.bf16.mxu0 %v2503_v9  ;;  %1279 = vmatpush1.bf16.msra.mxu1 %v2502_v11  ;;  %v2536_v0 = vld [vmem:[#allocation5 + $0x274] ss:$12 sps:$4 sm:$0xff]   ;;  %v2539_v9 = vld [vmem:[#allocation5 + $0xdc] ss:$12 sps:$4 sm:$0xff]   ;;  %v143_v11 = vmul.u32 2246822507, %v136_v63 }
  0x54   :  { %1280 = vmatprep.subr.bf16.mxu1 %v2506_v14  ;;  %2201 = vmatprep.mubr.msk.bf16.mxu1 %vm2199_vm3, %v2918_v57  ;;  %v2542_v13 = vld [vmem:[#allocation5 + $0x25c] ss:$12 sps:$4 sm:$0xff]   ;;  %v2544_v14 = vld [vmem:[#allocation5 + $0x258] ss:$12 sps:$4 sm:$0xff]   ;;  %vm2926_vm4 = vcmp.ge.s32.totalorder %v194_v60, 4194304  ;;  %vm2933_vm6 = vcmp.ge.s32.totalorder %v196_v5, 4194304 }
  0x55   :  { %v2545_v15 = vld [vmem:[#allocation5 + $0xc4] ss:$12 sps:$4 sm:$0xff]   ;;  %v82_v19 = vld [vmem:[#allocation2] sm:$0xff]  ;;  %vm2196_vm5 = vmpackc.low %vm2926_vm4, %vm2926_vm4  ;;  %v2037_v23 = vshrl.u32 %v143_v11, 13  ;;  %vm2801_vm14 = vmmov 0   ;;  %s2014_s27 = sshll.u32 %s2802_s26, 4  ;;  %s2015_s27 = int_to_ptr.vmem [resolvable:$true] %s2014_s27 }
  0x56   :  { %1240 = vmatpush2.bf16.msra.mxu0 %v2505_v17  ;;  %v2547_v17 = vld [vmem:[#allocation5 + $0xc0] ss:$12 sps:$4 sm:$0xff]   ;;  %v2548_v18 = vld [vmem:[#allocation5 + $0x244] ss:$12 sps:$4 sm:$0xff]   ;;  %v2551_v30 = vld [vmem:[#allocation5 + $0x3a8] ss:$12 sps:$4 sm:$0xff]   ;;  %p2768_p7 = scmp.lt.s32.totalorder %s2015_s27, %s2015_s27 }
  0x57   :  { %1241 = vmatprep.subr.bf16.mxu0 %v2509_v21  ;;  %1281 = vmatpush2.bf16.msra.mxu1 %v2508_v24  ;;  %v2550_v21 = vld [vmem:[#allocation5 + $0x240] ss:$12 sps:$4 sm:$0xff]   ;;  %v2557_v28 = vld [vmem:[#allocation5 + $0x170] ss:$12 sps:$4 sm:$0xff]   ;;  %vm2202_vm7 = vmpackc.low %vm2933_vm6, %vm2933_vm6 }
  0x58   :  { %1282 = vmatprep.subr.bf16.mxu1 %v2512_v27  ;;  %v2553_v24 = vld [vmem:[#allocation5 + $0x3ac] ss:$12 sps:$4 sm:$0xff]   ;;  %v2937_v27 = vpack.c.bf16 %v82_v19, %v82_v19  ;;  %v2566_v47 = vld [vmem:[#allocation5 + $0x364] ss:$12 sps:$4 sm:$0xff]   ;;  %v2572_v52 = vld [vmem:[#allocation5 + $0x128] ss:$12 sps:$4 sm:$0xff]  }
  0x59   :  { %v2562_v36 = vld [vmem:[#allocation5 + $0x158] ss:$12 sps:$4 sm:$0xff]   ;;  %v2568_v49 = vld [vmem:[#allocation5 + $0x80] ss:$12 sps:$4 sm:$0xff]   ;;  %v2577_v55 = vld [vmem:[#allocation5 + $0x110] ss:$12 sps:$4 sm:$0xff]  }
  0x5a   :  { %1242 = vmatpush2.bf16.msra.mxu0 %v2511_v31  ;;  %v164_v31 = vxor.u32 %v2037_v23, %v143_v11  ;;  %v2563_v42 = vld [vmem:[#allocation5 + $0x98] ss:$12 sps:$4 sm:$0xff]   ;;  %v2576_v58 = vld [vmem:[#allocation5 + $0x334] ss:$12 sps:$4 sm:$0xff]   ;;  %v2578_v60 = vld [vmem:[#allocation5 + $0x50] ss:$12 sps:$4 sm:$0xff]  }
  0x5b   :  { %1243 = vmatprep.subr.bf16.mxu0 %v2515_v34  ;;  %1283 = vmatpush2.bf16.msra.mxu1 %v2514_v35  ;;  %v2556_v34 = vld [vmem:[#allocation5 + $0x394] ss:$12 sps:$4 sm:$0xff]   ;;  %v2558_v35 = vld [vmem:[#allocation5 + $0xb0] ss:$12 sps:$4 sm:$0xff]   ;;  %v2571_v41 = vld [vmem:[#allocation5 + $0x34c] ss:$12 sps:$4 sm:$0xff]  }
  0x5c   :  { %1284 = vmatprep.subr.bf16.mxu1 %v2518_v37  ;;  %v2554_v37 = vld [vmem:[#allocation5 + $0x390] ss:$12 sps:$4 sm:$0xff]   ;;  %v171_v38 = vmul.u32 3266489909, %v164_v31  ;;  %v2587_v5 = vld [vmem:[#allocation5 + $0xe0] ss:$12 sps:$4 sm:$0xff]  }
  0x5d   :  { %v2591_v19 = vld [vmem:[#allocation5 + $0x46c] ss:$12 sps:$4 sm:$0xff]   ;;  %v2593_v23 = vld [vmem:[#allocation5 + $0x8] ss:$12 sps:$4 sm:$0xff]   ;;  %v2597_v25 = vld [vmem:[#allocation5 + $0x2f0] ss:$12 sps:$4 sm:$0xff]  }
  0x5e   :  { %1244 = vmatpush2.bf16.msra.mxu0 %v2517_v40  ;;  %v2561_v40 = vld [vmem:[#allocation5 + $0x37c] ss:$12 sps:$4 sm:$0xff]   ;;  %v87_v31 = vld [vmem:[#allocation2 + $0x28] sm:$0xff] }
  0x5f   :  { %1245 = vmatprep.subr.bf16.mxu0 %v2521_v43  ;;  %1285 = vmatpush2.bf16.msra.mxu1 %v2520_v44  ;;  %v135_v43 = vxor.u32 %v2029_v2, %v2890_v33  ;;  %v2567_v44 = vld [vmem:[#allocation5 + $0x140] ss:$12 sps:$4 sm:$0xff]   ;;  %v2573_v33 = vld [vmem:[#allocation5 + $0x68] ss:$12 sps:$4 sm:$0xff]   ;;  %v2973_v2 = vpack.c.bf16 %v87_v31, %v87_v31  ;;  %v2606_v16 = vld [vmem:[#allocation5 + $0x424] ss:$12 sps:$4 sm:$0xff]  }
  0x60   :  { %1286 = vmatprep.subr.bf16.mxu1 %v2524_v46  ;;  %v2559_v46 = vld [vmem:[#allocation5 + $0x378] ss:$12 sps:$4 sm:$0xff]   ;;  %v2638_v31 = vld [vmem:[#allocation5 + $0x440] ss:$12 sps:$4 sm:$0xff]   ;;  %v2667_v48 = vld [vmem:[#allocation7 + $0xb8] sm:$0xff]  }
  0x61   :  { %v2653_v26 = vld [vmem:[#allocation7 + $0x70] sm:$0xff]  }
  0x62   :  { %1246 = vmatpush2.bf16.msra.mxu0 %v2523_v50  ;;  %v142_v50 = vmul.u32 2246822507, %v135_v43  ;;  %v2603_v43 = vld [vmem:[#allocation5 + $0x218] ss:$12 sps:$4 sm:$0xff]  }
  0x63   :  { %1247 = vmatprep.subr.bf16.mxu0 %v2527_v53  ;;  %1287 = vmatpush2.bf16.msra.mxu1 %v2526_v6  ;;  %v2564_v53 = vld [vmem:[#allocation5 + $0x360] ss:$12 sps:$4 sm:$0xff]   ;;  %v2044_v6 = vshrl.u32 %v171_v38, 16 }
  0x64   :  { %1288 = vmatprep.subr.bf16.mxu1 %v2530_v56  ;;  %v2036_v54 = vshrl.u32 %v142_v50, 13  ;;  %v2569_v56 = vld [vmem:[#allocation5 + $0x348] ss:$12 sps:$4 sm:$0xff]  }
  0x65   :  { %v192_v63 = vxor.u32 %v2044_v6, %v171_v38  ;;  %v2594_v38 = vld [vmem:[#allocation5 + $0x450] ss:$12 sps:$4 sm:$0xff]  }
  0x66   :  { %1248 = vmatpush2.bf16.msra.mxu0 %v2529_v59  ;;  %v2618_v6 = vld [vmem:[#allocation5 + $0x1d0] ss:$12 sps:$4 sm:$0xff]  }
  0x67   :  { %1249 = vmatprep.subr.bf16.mxu0 %v2533_v61  ;;  %1289 = vmatpush2.bf16.msra.mxu1 %v2532_v62  ;;  %v2582_v61 = vld [vmem:[#allocation5 + $0xf8] ss:$12 sps:$4 sm:$0xff]   ;;  %v2574_v62 = vld [vmem:[#allocation5 + $0x330] ss:$12 sps:$4 sm:$0xff]   ;;  %v199_v11 = vand.u32 16777215, %v192_v63 }
  0x68   :  { %1290 = vmatprep.subr.bf16.mxu1 %v2536_v0  ;;  %v2583_v0 = vld [vmem:[#allocation5 + $0x38] ss:$12 sps:$4 sm:$0xff]  }
  0x69   :  { %vm2966_vm8 = vcmp.ge.s32.totalorder %v199_v11, 4194304  ;;  %v88_v11 = vld [vmem:[#allocation2 + $0x30] sm:$0xff] }
  0x6a   :  { %1250 = vmatpush2.bf16.msra.mxu0 %v2535_v8  ;;  %v163_v8 = vxor.u32 %v2036_v54, %v142_v50  ;;  %vm2205_vm9 = vmpackc.low %vm2966_vm8, %vm2966_vm8  ;;  %v2612_v50 = vld [vmem:[#allocation5 + $0x2a8] ss:$12 sps:$4 sm:$0xff]   ;;  %v2622_v54 = vld [vmem:[#allocation5 + $0x278] ss:$12 sps:$4 sm:$0xff]  }
  0x6b   :  { %1251 = vmatprep.subr.bf16.mxu0 %v2539_v9  ;;  %1291 = vmatpush2.bf16.msra.mxu1 %v2538_v10  ;;  %v2579_v10 = vld [vmem:[#allocation5 + $0x318] ss:$12 sps:$4 sm:$0xff]  }
  0x6c   :  { %1292 = vmatprep.subr.bf16.mxu1 %v2542_v13  ;;  %v2588_v13 = vld [vmem:[#allocation5 + $0x20] ss:$12 sps:$4 sm:$0xff]  }
  0x6e   :  { %1252 = vmatpush2.bf16.msra.mxu0 %v2541_v12  ;;  %v2586_v12 = vld [vmem:[#allocation5 + $0x304] ss:$12 sps:$4 sm:$0xff]  }
  0x6f   :  { %1253 = vmatprep.subr.bf16.mxu0 %v2545_v15  ;;  %1293 = vmatpush2.bf16.msra.mxu1 %v2544_v14  ;;  %v2592_v14 = vld [vmem:[#allocation5 + $0xc8] ss:$12 sps:$4 sm:$0xff]   ;;  %v170_v15 = vmul.u32 3266489909, %v163_v8  ;;  %v2631_v8 = vld [vmem:[#allocation5 + $0x484] ss:$12 sps:$4 sm:$0xff]  }
  0x70   :  { %1294 = vmatprep.subr.bf16.mxu1 %v2548_v18  ;;  %v2584_v18 = vld [vmem:[#allocation5 + $0x300] ss:$12 sps:$4 sm:$0xff]  }
  0x72   :  { %1254 = vmatpush2.bf16.msra.mxu0 %v2547_v17 }
  0x73   :  { %1305 = vmatprep.subr.bf16.mxu0 %v2553_v24  ;;  %1295 = vmatpush2.bf16.msra.mxu1 %v2550_v21  ;;  %v2589_v21 = vld [vmem:[#allocation5 + $0x468] ss:$12 sps:$4 sm:$0xff]   ;;  %v2642_v24 = vld [vmem:[#allocation5 + $0x410] ss:$12 sps:$4 sm:$0xff]  }
  0x74   :  { %2289 = vmatprep.subr.bf16.mxu1 %v2557_v28 }
  0x75   :  { %2198 = vmatmul.mubr.msk.bf16.vlgmr.msra.gmra.mxu0 %vm2196_vm5, %v2937_v27 }
  0x76   :  { %1306 = vmatpush1.bf16.msra.mxu0 %v2551_v30  ;;  %2204 = vmatmul.mubr.msk.bf16.vlgmr.msra.gmra.mxu1 %vm2202_vm7, %v2942_v32  ;;  %v2596_v30 = vld [vmem:[#allocation5 + $0x454] ss:$12 sps:$4 sm:$0xff]  }
  0x77   :  { %1307 = vmatprep.subr.bf16.mxu0 %v2556_v34  ;;  %2290 = vmatpush3.bf16.msra.mxu1 %v2558_v35  ;;  %v2043_v34 = vshrl.u32 %v170_v15, 16  ;;  %v2598_v35 = vld [vmem:[#allocation5 + $0x230] ss:$12 sps:$4 sm:$0xff]  }
  0x78   :  { %2214 = vmatprep.mubr.msk.bf16.mxu1 %vm2193_vm1, %v2907_v51  ;;  %2291 = vmatprep.subr.bf16.mxu1 %v2562_v36  ;;  %v137_v51 = vxor.u32 %v2031_v45, %v2893_v39  ;;  %v2581_v39 = vld [vmem:[#allocation5 + $0x31c] ss:$12 sps:$4 sm:$0xff]   ;;  %v2602_v36 = vld [vmem:[#allocation5 + $0x2d8] ss:$12 sps:$4 sm:$0xff]  }
  0x79   :  { %2207 = vmatprep.mubr.msk.bf16.mxu0 %vm2205_vm9, %v2973_v2  ;;  %v2599_v45 = vld [vmem:[#allocation5 + $0x438] ss:$12 sps:$4 sm:$0xff]  }
  0x7a   :  { %1308 = vmatpush1.bf16.msra.mxu0 %v2554_v37  ;;  %v144_v59 = vmul.u32 2246822507, %v137_v51  ;;  %v2609_v51 = vld [vmem:[#allocation5 + $0x408] ss:$12 sps:$4 sm:$0xff]  }
  0x7b   :  { %1309 = vmatprep.subr.bf16.mxu0 %v2561_v40  ;;  %2292 = vmatpush3.bf16.msra.mxu1 %v2563_v42  ;;  %v191_v40 = vxor.u32 %v2043_v34, %v170_v15  ;;  %v2601_v42 = vld [vmem:[#allocation5 + $0x43c] ss:$12 sps:$4 sm:$0xff]   ;;  %v2639_v34 = vld [vmem:[#allocation5 + $0x380] ss:$12 sps:$4 sm:$0xff]  }
  0x7c   :  { %2293 = vmatprep.subr.bf16.mxu1 %v2567_v44  ;;  %v2038_v9 = vshrl.u32 %v144_v59, 13  ;;  %v2607_v44 = vld [vmem:[#allocation5 + $0x2c0] ss:$12 sps:$4 sm:$0xff]  }
  0x7e   :  { %1310 = vmatpush1.bf16.msra.mxu0 %v2559_v46  ;;  %v165_v17 = vxor.u32 %v2038_v9, %v144_v59  ;;  %v198_v46 = vand.u32 16777215, %v191_v40  ;;  %v2623_v59 = vld [vmem:[#allocation5 + $0x1b8] ss:$12 sps:$4 sm:$0xff]   ;;  %v2633_v9 = vld [vmem:[#allocation5 + $0x188] ss:$12 sps:$4 sm:$0xff]  }
  0x7f   :  { %1311 = vmatprep.subr.bf16.mxu0 %v2566_v47  ;;  %2294 = vmatpush3.bf16.msra.mxu1 %v2568_v49  ;;  %v2608_v49 = vld [vmem:[#allocation5 + $0x200] ss:$12 sps:$4 sm:$0xff]   ;;  %v2644_v40 = vld [vmem:[#allocation5 + $0x3f8] ss:$12 sps:$4 sm:$0xff]  }
  0x80   :  { %2295 = vmatprep.subr.bf16.mxu1 %v2572_v52  ;;  %v172_v28 = vmul.u32 3266489909, %v165_v17  ;;  %vm2993_vm10 = vcmp.ge.s32.totalorder %v198_v46, 4194304  ;;  %v2799_v17 = vmov 0.0   ;;  %v2649_v46 = vld [vmem:[#allocation5 + $0x308] ss:$12 sps:$4 sm:$0xff]  }
  0x81   :  { %vm2208_vm11 = vmpackc.low %vm2993_vm10, %vm2993_vm10 }
  0x82   :  { %1312 = vmatpush1.bf16.msra.mxu0 %v2564_v53  ;;  %v2045_v37 = vshrl.u32 %v172_v28, 16  ;;  %v2611_v53 = vld [vmem:[#allocation5 + $0x40c] ss:$12 sps:$4 sm:$0xff]  }
  0x83   :  { %1313 = vmatprep.subr.bf16.mxu0 %v2571_v41  ;;  %2296 = vmatpush3.bf16.msra.mxu1 %v2573_v33  ;;  %v2617_v41 = vld [vmem:[#allocation5 + $0x290] ss:$12 sps:$4 sm:$0xff]   ;;  %v2616_v33 = vld [vmem:[#allocation5 + $0x3f4] ss:$12 sps:$4 sm:$0xff]  }
  0x84   :  { %2297 = vmatprep.subr.bf16.mxu1 %v2577_v55  ;;  %v193_v47 = vxor.u32 %v2045_v37, %v172_v28  ;;  %v2614_v55 = vld [vmem:[#allocation5 + $0x3f0] ss:$12 sps:$4 sm:$0xff]   ;;  %v2656_v37 = vld [vmem:[#allocation7 + $0x28] sm:$0xff]  }
  0x85   :  { %v2652_v28 = vld [vmem:[#allocation7 + $0x38] sm:$0xff]  }
  0x86   :  { %1314 = vmatpush1.bf16.msra.mxu0 %v2569_v56  ;;  %v200_v52 = vand.u32 16777215, %v193_v47  ;;  %v2621_v56 = vld [vmem:[#allocation5 + $0x3dc] ss:$12 sps:$4 sm:$0xff]  }
  0x87   :  { %1315 = vmatprep.subr.bf16.mxu0 %v2576_v58  ;;  %2298 = vmatpush3.bf16.msra.mxu1 %v2578_v60  ;;  %v2619_v58 = vld [vmem:[#allocation5 + $0x3d8] ss:$12 sps:$4 sm:$0xff]  }
  0x88   :  { %2299 = vmatprep.subr.bf16.mxu1 %v2582_v61  ;;  %v2626_v60 = vld [vmem:[#allocation5 + $0x3c4] ss:$12 sps:$4 sm:$0xff]   ;;  %v2627_v61 = vld [vmem:[#allocation5 + $0x260] ss:$12 sps:$4 sm:$0xff]   ;;  %vm3000_vm12 = vcmp.ge.s32.totalorder %v200_v52, 4194304  ;;  %v2657_v47 = vld [vmem:[#allocation7 + $0x60] sm:$0xff]  }
  0x89   :  { %v214_v15 = vsel %vm3000_vm12, %v88_v11, 0.0  ;;  %v2662_v52 = vld [vmem:[#allocation7 + $0x10] sm:$0xff]  }
  0x8a   :  { %1316 = vmatpush1.bf16.msra.mxu0 %v2574_v62  ;;  %v2628_v62 = vld [vmem:[#allocation5 + $0x1a0] ss:$12 sps:$4 sm:$0xff]  }
  0x8b   :  { %1317 = vmatprep.subr.bf16.mxu0 %v2581_v39  ;;  %2300 = vmatpush3.bf16.msra.mxu1 %v2583_v0  ;;  %v2632_v39 = vld [vmem:[#allocation5 + $0x248] ss:$12 sps:$4 sm:$0xff]   ;;  %v2624_v0 = vld [vmem:[#allocation5 + $0x3c0] ss:$12 sps:$4 sm:$0xff]  }
  0x8c   :  { %2301 = vmatprep.subr.bf16.mxu1 %v2587_v5  ;;  %v86_v5 = vld [vmem:[#allocation2 + $0x20] sm:$0xff] }
  0x8e   :  { %1318 = vmatpush1.bf16.msra.mxu0 %v2579_v10  ;;  %v2629_v10 = vld [vmem:[#allocation5 + $0x480] ss:$12 sps:$4 sm:$0xff]  }
  0x8f   :  { %1319 = vmatprep.subr.bf16.mxu0 %v2586_v12  ;;  %2302 = vmatpush3.bf16.msra.mxu1 %v2588_v13  ;;  %v3004_v12 = vpack.c.bf16 %v86_v5, %v86_v5  ;;  %v2634_v13 = vld [vmem:[#allocation5 + $0x470] ss:$12 sps:$4 sm:$0xff]  }
  0x90   :  { %2303 = vmatprep.subr.bf16.mxu1 %v2592_v14  ;;  %v2650_v14 = vld [vmem:[#allocation5 + $0x488] ss:$12 sps:$4 sm:$0xff]  }
  0x92   :  { %1320 = vmatpush1.bf16.msra.mxu0 %v2584_v18  ;;  %v2800_v18 = vmov 0  }
  0x93   :  { %1321 = vmatprep.subr.bf16.mxu0 %v2591_v19  ;;  %2304 = vmatpush3.bf16.msra.mxu1 %v2593_v23  ;;  %v2635_v19 = vld [vmem:[#allocation5 + $0x3b0] ss:$12 sps:$4 sm:$0xff]   ;;  %v2636_v23 = vld [vmem:[#allocation5 + $0x458] ss:$12 sps:$4 sm:$0xff]  }
  0x94   :  { %2311 = vmatprep.subr.bf16.mxu1 %v2597_v25  ;;  %v2651_v25 = vld [vmem:[#allocation7 + $0x78] sm:$0xff]  }
  0x96   :  { %1322 = vmatpush2.bf16.msra.mxu0 %v2589_v21  ;;  %2217 = vmatmul.mubr.msk.bf16.vlgmr.msra.gmra.mxu1 %vm2196_vm5, %v2937_v27  ;;  %v2604_v27 = vld [vmem:[#allocation5 + $0x420] ss:$12 sps:$4 sm:$0xff]   ;;  %v221_v21 = vpack.c.bf16 %v214_v15, %v214_v15 }
  0x97   :  { %1323 = vmatprep.subr.bf16.mxu0 %v2596_v30  ;;  %2312 = vmatpush3.bf16.msra.mxu1 %v2598_v35  ;;  %v2637_v30 = vld [vmem:[#allocation5 + $0x398] ss:$12 sps:$4 sm:$0xff]  }
  0x98   :  { %2220 = vmatprep.mubr.msk.bf16.mxu1 %vm2199_vm3, %v2918_v57  ;;  %2313 = vmatprep.subr.bf16.mxu1 %v2602_v36  ;;  %v2613_v57 = vld [vmem:[#allocation5 + $0x1e8] ss:$12 sps:$4 sm:$0xff]   ;;  %v2655_v35 = vld [vmem:[#allocation7 + $0x68] sm:$0xff]  }
  0x99   :  { %v2640_v36 = vld [vmem:[#allocation5 + $0x428] ss:$12 sps:$4 sm:$0xff]  }
  0x9a   :  { %1324 = vmatpush2.bf16.msra.mxu0 %v2594_v38  ;;  %v2641_v38 = vld [vmem:[#allocation5 + $0x368] ss:$12 sps:$4 sm:$0xff]  }
  0x9b   :  { %1325 = vmatprep.subr.bf16.mxu0 %v2601_v42  ;;  %2314 = vmatpush3.bf16.msra.mxu1 %v2603_v43  ;;  %v2645_v42 = vld [vmem:[#allocation5 + $0x338] ss:$12 sps:$4 sm:$0xff]   ;;  %v2646_v43 = vld [vmem:[#allocation5 + $0x3e0] ss:$12 sps:$4 sm:$0xff]  }
  0x9c   :  { %2315 = vmatprep.subr.bf16.mxu1 %v2607_v44  ;;  %v2647_v44 = vld [vmem:[#allocation5 + $0x320] ss:$12 sps:$4 sm:$0xff]  }
  0x9e   :  { %1326 = vmatpush2.bf16.msra.mxu0 %v2599_v45  ;;  %v2648_v45 = vld [vmem:[#allocation5 + $0x3c8] ss:$12 sps:$4 sm:$0xff]  }
  0x9f   :  { %1327 = vmatprep.subr.bf16.mxu0 %v2606_v16  ;;  %2316 = vmatpush3.bf16.msra.mxu1 %v2608_v49  ;;  %v2658_v16 = vld [vmem:[#allocation7 + $0x20] sm:$0xff]   ;;  %v2660_v49 = vld [vmem:[#allocation7 + $0x18] sm:$0xff]  }
  0xa0   :  { %2317 = vmatprep.subr.bf16.mxu1 %v2612_v50  ;;  %v2661_v50 = vld [vmem:[#allocation7 + $0x50] sm:$0xff]  }
  0xa2   :  { %1328 = vmatpush2.bf16.msra.mxu0 %v2604_v27  ;;  %v2659_v27 = vld [vmem:[#allocation7 + $0x58] sm:$0xff]  }
  0xa3   :  { %1329 = vmatprep.subr.bf16.mxu0 %v2611_v53  ;;  %2318 = vmatpush3.bf16.msra.mxu1 %v2613_v57  ;;  %v2663_v53 = vld [vmem:[#allocation7 + $0x48] sm:$0xff]  }
  0xa4   :  { %2319 = vmatprep.subr.bf16.mxu1 %v2617_v41  ;;  %v2664_v57 = vld [vmem:[#allocation7 + $0x8] sm:$0xff]   ;;  %v2665_v41 = vld [vmem:[#allocation7 + $0x40] sm:$0xff]  }
  0xa6   :  { %1330 = vmatpush2.bf16.msra.mxu0 %v2609_v51  ;;  %v2666_v51 = vld [vmem:[#allocation7] sm:$0xff]  }
  0xa7   :  { %1331 = vmatprep.subr.bf16.mxu0 %v2616_v33  ;;  %2320 = vmatpush3.bf16.msra.mxu1 %v2618_v6  ;;  %v2668_v33 = vld [vmem:[#allocation7 + $0xb0] sm:$0xff]   ;;  %v2669_v6 = vld [vmem:[#allocation7 + $0xa8] sm:$0xff]  }
  0xa8   :  { %2321 = vmatprep.subr.bf16.mxu1 %v2622_v54  ;;  %v2670_v54 = vld [vmem:[#allocation7 + $0xa0] sm:$0xff]  }
  0xaa   :  { %1332 = vmatpush2.bf16.msra.mxu0 %v2614_v55  ;;  %v2671_v55 = vld [vmem:[#allocation7 + $0x98] sm:$0xff]  }
  0xab   :  { %1333 = vmatprep.subr.bf16.mxu0 %v2621_v56  ;;  %2322 = vmatpush3.bf16.msra.mxu1 %v2623_v59  ;;  %v2672_v56 = vld [vmem:[#allocation7 + $0x90] sm:$0xff]   ;;  %v2674_v59 = vld [vmem:[#allocation7 + $0x80] sm:$0xff]  }
  0xac   :  { %2323 = vmatprep.subr.bf16.mxu1 %v2627_v61  ;;  %v3052_v61 = vld [vmem:[%s3094_s2] sm:$0x7] }
  0xae   :  { %1334 = vmatpush2.bf16.msra.mxu0 %v2619_v58  ;;  %v2673_v58 = vld [vmem:[#allocation7 + $0x88] sm:$0xff]  }
  0xaf   :  { %1335 = vmatprep.subr.bf16.mxu0 %v2626_v60  ;;  %2324 = vmatpush3.bf16.msra.mxu1 %v2628_v62  ;;  %v422_v60 = vsub.s32 0, %v2855_v1  ;;  %v426_v62 = vsub.s32 1, %v2855_v1 }
  0xb0   :  { %2325 = vmatprep.subr.bf16.mxu1 %v2632_v39 }
  0xb1   :  { %v423_v63 = vrot.slane %v3052_v61, %v422_v60  ;;  %v427_v39 = vrot.slane %v3052_v61, %v426_v62 }
  0xb2   :  { %1336 = vmatpush2.bf16.msra.mxu0 %v2624_v0 }
  0xb3   :  { %1360 = vmatprep.subr.bf16.mxu0 %v2631_v8  ;;  %2326 = vmatpush3.bf16.msra.mxu1 %v2633_v9 }
  0xb4   :  { %2397 = vmatprep.subr.bf16.mxu1 %v2799_v17 }
  0xb5   :  { %2210 = vmatmul.mubr.msk.bf16.vlgmr.msra.gmra.mxu0 %vm2208_vm11, %v3004_v12 }
  0xb6   :  { %1361 = vmatpush1.bf16.msra.mxu0 %v2629_v10  ;;  %1378 = vmatprep.mubr.bf16.mxu0 %v2800_v18 }
  0xb7   :  { %2223 = vmatmul.mubr.msk.bf16.vlgmr.msra.gmra.mxu1 %vm2202_vm7, %v2942_v32  ;;  %2333 = vmatprep.subr.bf16.mxu0 %v2634_v13  ;;  %v2654_v32 = vld [vmem:[#allocation7 + $0x30] sm:$0xff]  }
  0xb8   :  { %2398 = vmatpush3.bf16.msra.mxu1 %v2650_v14  ;;  %2399 = vmatprep.mubr.msk.bf16.mxu1 %vm2801_vm14, %v2799_v17 }
  0xb9   :  { %2357 = vmatprep.subr.bf16.mxu1 %v2651_v25 }
  0xbd   :  { %2211 = vmatmul.mubr.msk.bf16.vlgmr.msra.gmra.mxu0 %vm1219_vm13, %v221_v21 }
  0xbe   :  { %2334 = vmatpush3.bf16.msra.mxu0 %v2635_v19  ;;  %2226 = vmatprep.mubr.msk.bf16.mxu0 %vm2205_vm9, %v2973_v2  ;;  %v2643_v2 = vld [vmem:[#allocation5 + $0x350] ss:$12 sps:$4 sm:$0xff]  }
  0xbf   :  { %2335 = vmatprep.subr.bf16.mxu0 %v2636_v23  ;;  %2400 = vmatmul.mubr.msk.bf16.vlgmr.msra.gmra.mxu1 %vm1219_vm13, %v221_v21  ;;  %v1550_v21 = vadd.s32 2238012522, %v2863_v4 }
  0xc0   :  { %2358 = vmatpush3.bf16.msra.mxu1 %v2652_v28 }
  0xc1   :  { %2359 = vmatprep.subr.bf16.mxu1 %v2653_v26  ;;  %v1552_v25 = vxor.u32 %v1550_v21, %v104_v7 }
  0xc2   :  { %2336 = vmatpush3.bf16.msra.mxu0 %v2637_v30  ;;  %v1551_v30 = vxor.u32 %v1550_v21, %v2878_v22 }
  0xc3   :  { %2337 = vmatprep.subr.bf16.mxu0 %v2638_v31 }
  0xc4   :  { %2360 = vmatpush3.bf16.msra.mxu1 %v2654_v32  ;;  %v2232_v32 = vshrl.u32 %v1552_v25, 16 }
  0xc5   :  { %2361 = vmatprep.subr.bf16.mxu1 %v2655_v35  ;;  %v2231_v35 = vshrl.u32 %v1551_v30, 16 }
  0xc6   :  { %2338 = vmatpush3.bf16.msra.mxu0 %v2639_v34 }
  0xc7   :  { %2339 = vmatprep.subr.bf16.mxu0 %v2640_v36  ;;  %v1561_v36 = vxor.u32 %v2232_v32, %v1552_v25 }
  0xc8   :  { %2362 = vmatpush3.bf16.msra.mxu1 %v2656_v37  ;;  %v1560_v37 = vxor.u32 %v2231_v35, %v1551_v30 }
  0xc9   :  { %2363 = vmatprep.subr.bf16.mxu1 %v2657_v47 }
  0xca   :  { %2340 = vmatpush3.bf16.msra.mxu0 %v2641_v38  ;;  %v1564_v38 = vmul.u32 2246822507, %v1561_v36 }
  0xcb   :  { %2341 = vmatprep.subr.bf16.mxu0 %v2642_v24  ;;  %v1563_v24 = vmul.u32 2246822507, %v1560_v37 }
  0xcc   :  { %2364 = vmatpush3.bf16.msra.mxu1 %v2658_v16 }
  0xcd   :  { %2365 = vmatprep.subr.bf16.mxu1 %v2659_v27 }
  0xce   :  { %2342 = vmatpush3.bf16.msra.mxu0 %v2643_v2  ;;  %v2235_v2 = vshrl.u32 %v1564_v38, 13 }
  0xcf   :  { %2343 = vmatprep.subr.bf16.mxu0 %v2644_v40  ;;  %v2234_v40 = vshrl.u32 %v1563_v24, 13 }
  0xd0   :  { %2366 = vmatpush3.bf16.msra.mxu1 %v2660_v49 }
  0xd1   :  { %2367 = vmatprep.subr.bf16.mxu1 %v2661_v50 }
  0xd2   :  { %2344 = vmatpush3.bf16.msra.mxu0 %v2645_v42  ;;  %v1573_v42 = vxor.u32 %v2235_v2, %v1564_v38 }
  0xd3   :  { %2345 = vmatprep.subr.bf16.mxu0 %v2646_v43  ;;  %v1572_v43 = vxor.u32 %v2234_v40, %v1563_v24 }
  0xd4   :  { %2368 = vmatpush3.bf16.msra.mxu1 %v2662_v52 }
  0xd5   :  { %2369 = vmatprep.subr.bf16.mxu1 %v2663_v53 }
  0xd6   :  { %2346 = vmatpush3.bf16.msra.mxu0 %v2647_v44  ;;  %v1576_v44 = vmul.u32 3266489909, %v1573_v42  ;;  %v2675_v42 = vld [vmem:[#allocation8 + $0x38] sm:$0xff]  }
  0xd7   :  { %2347 = vmatprep.subr.bf16.mxu0 %v2648_v45  ;;  %v1575_v45 = vmul.u32 3266489909, %v1572_v43  ;;  %v2678_v43 = vld [vmem:[#allocation8 + $0x20] sm:$0xff]  }
  0xd8   :  { %2370 = vmatpush3.bf16.msra.mxu1 %v2664_v57  ;;  %v2238_v3 = vshrl.u32 %v1576_v44, 16 }
  0xd9   :  { %2371 = vmatprep.subr.bf16.mxu1 %v2665_v41 }
  0xda   :  { %2348 = vmatpush3.bf16.msra.mxu0 %v2649_v46  ;;  %v2237_v46 = vshrl.u32 %v1575_v45, 16  ;;  %v1585_v27 = vxor.u32 %v2238_v3, %v1576_v44  ;;  %v2679_v44 = vld [vmem:[#allocation8 + $0x18] sm:$0xff]   ;;  %v2681_v3 = vld [vmem:[#allocation8 + $0x8] sm:$0xff]  }
  0xdb   :  { %2403 = vmatprep.subr.bf16.mxu0 %v2799_v17 }
  0xdc   :  { %2372 = vmatpush3.bf16.msra.mxu1 %v2666_v51  ;;  %v1584_v52 = vxor.u32 %v2237_v46, %v1575_v45  ;;  %v1588_v51 = vand.u32 16777215, %v1585_v27  ;;  %v2680_v45 = vld [vmem:[#allocation8 + $0x10] sm:$0xff]   ;;  %v1879_v46 = vadd.s32 1209535135, %v2863_v4 }
  0xdd   :  { %2229 = vmatmul.mubr.msk.bf16.vlgmr.msra.gmra.mxu0 %vm2208_vm11, %v3004_v12  ;;  %2423 = vmatprep.subr.bf16.mxu1 %v2799_v17 }
  0xde   :  { %2419 = vmatprep.mubr.msk.bf16.mxu0 %vm2801_vm14, %v2799_v17  ;;  %2404 = vmatpush3.bf16.msra.mxu0 %v2667_v48  ;;  %v1553_v48 = vxor.u32 %v1550_v21, %v105_v29  ;;  %vm3063_vm15 = vcmp.ge.s32.totalorder %v1588_v51, 4194304 }
  0xdf   :  { %2405 = vmatprep.subr.bf16.mxu0 %v2799_v17  ;;  %vm2265_vm1 = vmpackc.low %vm3063_vm15, %vm3063_vm15 }
  0xe2   :  { %2406 = vmatpush3.bf16.msra.mxu0 %v2668_v33 }
  0xe3   :  { %2407 = vmatprep.subr.bf16.mxu0 %v2799_v17 }
  0xe6   :  { %2408 = vmatpush3.bf16.msra.mxu0 %v2669_v6  ;;  %v1587_v6 = vand.u32 16777215, %v1584_v52 }
  0xe7   :  { %2409 = vmatprep.subr.bf16.mxu0 %v2799_v17 }
  0xe8   :  { %vm1590_vm0 = vcmp.ge.s32.totalorder %v1587_v6, 4194304 }
  0xe9   :  { %vm2268_vm2 = vmpackc.low %vm1590_vm0, %vm1590_vm0 }
  0xea   :  { %2410 = vmatpush3.bf16.msra.mxu0 %v2670_v54 }
  0xeb   :  { %2411 = vmatprep.subr.bf16.mxu0 %v2799_v17 }
  0xee   :  { %2412 = vmatpush3.bf16.msra.mxu0 %v2671_v55 }
  0xef   :  { %2413 = vmatprep.subr.bf16.mxu0 %v2799_v17 }
  0xf2   :  { %2414 = vmatpush3.bf16.msra.mxu0 %v2672_v56 }
  0xf3   :  { %2415 = vmatprep.subr.bf16.mxu0 %v2799_v17 }
  0xf6   :  { %2416 = vmatpush3.bf16.msra.mxu0 %v2673_v58 }
  0xf7   :  { %2417 = vmatprep.subr.bf16.mxu0 %v2799_v17 }
  0xfa   :  { %2418 = vmatpush3.bf16.msra.mxu0 %v2674_v59 }
 0x135   :  { %v1257_v0 = vpop.f32.mrf.mxu0 }
 0x136   :  { %v1258_v5 = vadd.f32 %v1257_v0, %v423_v63  ;;  %v1298_v9 = vpop.f32.mrf.mxu1  ;;  %v2233_v63 = vshrl.u32 %v1553_v48, 16 }
 0x137   :  { %v1259_v8 = vpop.f32.mrf.mxu0 }
 0x138   :  { %v1260_v10 = vadd.f32 %v1259_v8, %v427_v39  ;;  %v1299_v11 = vadd.f32 %v1298_v9, %v1258_v5  ;;  %v1300_v13 = vpop.f32.mrf.mxu1 }
 0x139   :  { %v1261_v12 = vpop.f32.mrf.mxu0 }
 0x13a   :  { %v1301_v14 = vadd.f32 %v1300_v13, %v1260_v10  ;;  %v1302_v18 = vpop.f32.mrf.mxu1  ;;  %v1562_v10 = vxor.u32 %v2233_v63, %v1553_v48 }
 0x13b   :  { %v1262_v15 = vpop.f32.mrf.mxu0  ;;  %v430_v18 = vsub.s32 2, %v2855_v1 }
 0x13c   :  { %v1303_v19 = vpop.f32.mrf.mxu1  ;;  %v1565_v13 = vmul.u32 2246822507, %v1562_v10 }
 0x13d   :  { %v431_v21 = vrot.slane %v3052_v61, %v430_v18  ;;  %v2676_v61 = vld [vmem:[#allocation8 + $0x30] sm:$0xff]  }
 0x156   :  { %v2305_v23 = vpop.f32.mrf.mxu1 }
 0x158   :  { %v2306_v28 = vpop.f32.mrf.mxu1 }
 0x159   :  { %v2307_v31 = vadd.f32 %v2306_v28, %v2305_v23 }
 0x15a   :  { %v2308_v26 = vpop.f32.mrf.mxu1 }
 0x15b   :  { %v1422_v25 = vadd.f32 %v2307_v31, %v431_v21  ;;  %v2677_v31 = vld [vmem:[#allocation8 + $0x28] sm:$0xff]  }
 0x15c   :  { %v2309_v34 = vpop.f32.mrf.mxu1 }
 0x175   :  { %v1339_v7 = vpop.f32.mrf.mxu0 }
 0x176   :  { %v1340_v41 = vadd.f32 %v1339_v7, %v1299_v11  ;;  %v2682_v7 = vld [vmem:[#allocation8] sm:$0xff]  }
 0x177   :  { %v1341_v47 = vpop.f32.mrf.mxu0  ;;  %v2327_v16 = vpop.f32.mrf.mxu1 }
 0x178   :  { %v1342_v55 = vadd.f32 %v1341_v47, %v1301_v14  ;;  %v2236_v14 = vshrl.u32 %v1565_v13, 13  ;;  %v1880_v47 = vxor.u32 %v1879_v46, %v2878_v22 }
 0x179   :  { %v1343_v49 = vpop.f32.mrf.mxu0  ;;  %v2328_v50 = vpop.f32.mrf.mxu1 }
 0x17a   :  { %v1574_v15 = vxor.u32 %v2236_v14, %v1565_v13  ;;  %v2329_v28 = vadd.f32 %v2328_v50, %v2327_v16  ;;  %v2274_v27 = vshrl.u32 %v1880_v47, 16 }
 0x17b   :  { %v1344_v53 = vpop.f32.mrf.mxu0  ;;  %v2330_v57 = vpop.f32.mrf.mxu1 }
 0x17c   :  { %v1577_v19 = vmul.u32 3266489909, %v1574_v15  ;;  %v1462_v34 = vadd.f32 %v2329_v28, %v1422_v25  ;;  %v1883_v52 = vxor.u32 %v2274_v27, %v1880_v47 }
 0x17d   :  { %v1380_v33 = vpop.f32.mrf.mxu0  ;;  %v2331_v54 = vpop.f32.mrf.mxu1 }
 0x17e   :  { %v1381_v56 = vadd.f32 %v1380_v33, %v1340_v41  ;;  %v2239_v23 = vshrl.u32 %v1577_v19, 16  ;;  %v1884_v57 = vmul.u32 2246822507, %v1883_v52 }
 0x17f   :  { %v1382_v58 = vpop.f32.mrf.mxu0  ;;  %v1541_v59 = vpop.f32.mrf.mxu1 }
 0x180   :  { %v1383_v60 = vadd.f32 %v1382_v58, %v1342_v55  ;;  %v1547_v39 = vmax.f32 %v1381_v56, 0.0  ;;  %v1586_v30 = vxor.u32 %v2239_v23, %v1577_v19  ;;  %v2275_v41 = vshrl.u32 %v1884_v57, 13 }
 0x181   :  { %v1384_v0 = vpop.f32.mrf.mxu0  ;;  %v2401_v5 = vpop.f32.mrf.mxu1 }
 0x182   :  { %v1548_v8 = vmax.f32 %v1383_v60, 0.0  ;;  %v2269_v11 = vpack.c.bf16 %v1547_v39, %v1547_v39  ;;  %v1589_v36 = vand.u32 16777215, %v1586_v30  ;;  %v1887_v51 = vxor.u32 %v2275_v41, %v1884_v57  ;;  %v2277_v39 = vld [vmem:[%s3098_s6] ss:$0 sm:$0xff] }
 0x183   :  { %v1385_v20 = vpop.f32.mrf.mxu0  ;;  %v1544_v29 = vpop.f32.mrf.mxu1 }
 0x184   :  { %v2266_v9 = vpack.c.bf16 %v1548_v8, %v1548_v8  ;;  %vm1592_vm3 = vcmp.ge.s32.totalorder %v1589_v36, 4194304  ;;  %v1888_v48 = vmul.u32 3266489909, %v1887_v51 }
 0x185   :  { %v2402_v12 = vpop.f32.mrf.mxu1  ;;  %vm2271_vm4 = vmpackc.low %vm1592_vm3, %vm1592_vm3 }
 0x186   :  { %2267 = vmatprep.mubr.msk.bf16.mxu1 %vm2265_vm1, %v2266_v9  ;;  %v2276_v33 = vshrl.u32 %v1888_v48, 16 }
 0x187   :  { %2270 = vmatmul.mubr.msk.bf16.vlgmr.msra.gmra.mxu1 %vm2268_vm2, %v2269_v11 }
 0x188   :  { %2439 = vmatprep.mubr.msk.bf16.mxu1 %vm2801_vm14, %v2799_v17  ;;  %2424 = vmatpush3.bf16.msra.mxu1 %v2675_v42  ;;  %v1891_v6 = vxor.u32 %v2276_v33, %v1888_v48 }
 0x189   :  { %2425 = vmatprep.subr.bf16.mxu1 %v2799_v17 }
 0x18a   :  { %v1892_v4 = vand.u32 16777215, %v1891_v6 }
 0x18c   :  { %2426 = vmatpush3.bf16.msra.mxu1 %v2676_v61  ;;  %vm1893_vm5 = vcmp.ge.s32.totalorder %v1892_v4, 4194304 }
 0x18d   :  { %2427 = vmatprep.subr.bf16.mxu1 %v2799_v17  ;;  %vm2286_vm6 = vmpackc.low %vm1893_vm5, %vm1893_vm5 }
 0x190   :  { %2428 = vmatpush3.bf16.msra.mxu1 %v2677_v31 }
 0x191   :  { %2429 = vmatprep.subr.bf16.mxu1 %v2799_v17 }
 0x194   :  { %2430 = vmatpush3.bf16.msra.mxu1 %v2678_v43 }
 0x195   :  { %2431 = vmatprep.subr.bf16.mxu1 %v2799_v17 }
 0x198   :  { %2432 = vmatpush3.bf16.msra.mxu1 %v2679_v44 }
 0x199   :  { %2433 = vmatprep.subr.bf16.mxu1 %v2799_v17 }
 0x19c   :  { %2434 = vmatpush3.bf16.msra.mxu1 %v2680_v45 }
 0x19d   :  { %v2349_v26 = vpop.f32.mrf.mxu0  ;;  %2435 = vmatprep.subr.bf16.mxu1 %v2799_v17 }
 0x19f   :  { %v2350_v32 = vpop.f32.mrf.mxu0 }
 0x1a0   :  { %v2351_v35 = vadd.f32 %v2350_v32, %v2349_v26  ;;  %2436 = vmatpush3.bf16.msra.mxu1 %v2681_v3 }
 0x1a1   :  { %v2352_v37 = vpop.f32.mrf.mxu0  ;;  %2437 = vmatprep.subr.bf16.mxu1 %v2799_v17  ;;  %v2240_v17 = vld [vmem:[%s3096_s4] ss:$0 sm:$0xff]  ;;  %s2763_s4 = scalar_lea.vmem %s2015_s27, 128 }
 0x1a2   :  { %v1502_v38 = vadd.f32 %v2351_v35, %v1462_v34  ;;  %p2764_p6 = scmp.ne.s32.totalorder %s2015_s27, %s2763_s4  ;;  %p2769_p8 = scmp.lt.s32.totalorder %s2763_s4, %s2763_s4 }
 0x1a3   :  { %v2353_v24 = vpop.f32.mrf.mxu0 }
 0x1a4   :  { %v1542_v2 = vadd.f32 %v1541_v59, %v1502_v38  ;;  %2438 = vmatpush3.bf16.msra.mxu1 %v2682_v7  ;;  %p2770_p9 = por %p2769_p8, %p2768_p7 }
 0x1a6   :  { %v1549_v40 = vmax.f32 %v1542_v2, 0.0  ;;  %p2771_p10 = pnand %p2770_p9, %p2764_p6 }
 0x1a8   :  { %v2272_v1 = vpack.c.bf16 %v1549_v40, %v1549_v40 }
 0x1aa   :  { %2420 = vmatmul.mubr.msk.bf16.vlgmr.msra.gmra.mxu0 %vm2271_vm4, %v2272_v1 }
 0x247   :  { %v2373_v16 = vpop.f32.mrf.mxu1 }
 0x249   :  { %v2374_v49 = vpop.f32.mrf.mxu1 }
 0x24a   :  { %v2375_v54 = vadd.f32 %v2374_v49, %v2373_v16 }
 0x24b   :  { %v2376_v50 = vpop.f32.mrf.mxu1 }
 0x24c   :  { %v1833_v55 = vadd.f32 %v2375_v54, %v2240_v17 }
 0x24d   :  { %v2377_v53 = vpop.f32.mrf.mxu1 }
 0x26a   :  { %v1872_v22 = vpop.f32.mrf.mxu0 }
 0x26b   :  { %v1873_v56 = vadd.f32 %v1872_v22, %v1833_v55 }
 0x26c   :  { %v2421_v58 = vpop.f32.mrf.mxu0 }
 0x26d   :  { %v1878_v59 = vmax.f32 %v1873_v56, 0.0 }
 0x26e   :  { %v1875_v60 = vpop.f32.mrf.mxu0 }
 0x26f   :  { %v2287_v62 = vpack.c.bf16 %v1878_v59, %v1878_v59 }
 0x270   :  { %v2422_v63 = vpop.f32.mrf.mxu0 }
 0x271   :  { %2440 = vmatmul.mubr.msk.bf16.vlgmr.msra.gmra.mxu1 %vm2286_vm6, %v2287_v62 }
 0x331   :  { %v2001_v0 = vpop.f32.mrf.mxu1 }
 0x332   :  { %v2002_v5 = vadd.f32 %v2277_v39, %v2001_v0 }
 0x333   :  { %v2441_v8 = vpop.f32.mrf.mxu1 }
 0x334   :  { %2007 = vst [vmem:[#allocation10] sm:$0xff] %v2002_v5 }
 0x335   :  { %v2004_v20 = vpop.f32.mrf.mxu1 }
 0x336   :  { %2774 = shalt.err (!%p2771_p10)
}
 0x337   :  { %2017 = dma.vmem_to_hbm [thread:$0]  %s2015_s27, 128, %s3099_s7, [#allocation4]   ;;  %v2442_v29 = vpop.f32.mrf.mxu1 }
 0x338   :  { %2789 = dma.done.wait [#allocation4], 128  }
 0x339   :  { %2790 = vsyncadd [#allocation4], 4294967168 }
 0x33a   :  { %2021 = vsyncpa [#allocation3], 1 }
 0x33b   :  { %2022 = vsyncpa [#allocation6], 1 }
 0x33c   :  { %2023 = vsyncpa [#allocation9], 1 }
 0x33d   :  { %2024 = vsyncpa [#allocation4], 1 }

</bundles_post_ra>
